<compile_context>
chip_gen: v7x
topology: tpu7x:2x2x1
jax: 0.10.0
libtpu: 0.0.40
codegen_flags: <defaults>
</compile_context>

<pallas_src>
import functools
import numpy as np
import jax
import jax.numpy as jnp
from jax import lax
from jax.experimental import pallas as pl
from jax.experimental.pallas import tpu as pltpu

# ---- fixed constants (pytorch_msssim defaults: win=11, sigma=1.5, data_range=1) ----
WIN = 11
SIGMA = 1.5
_coords = np.arange(WIN, dtype=np.float64) - WIN // 2
_g = np.exp(-(_coords ** 2) / (2.0 * SIGMA ** 2))
_g = _g / _g.sum()
GAUSS = tuple(float(v) for v in _g)          # deterministic gaussian window

C1 = (0.01 * 1.0) ** 2                       # (K1 * data_range)^2
C2 = (0.03 * 1.0) ** 2                       # (K2 * data_range)^2
NBINS = 256
_NT = (((1,), (1,)), ((), ()))               # contract last dims of both (A @ B^T on MXU)


def _make_tap_matrix(width):
    """(W, W-WIN+1) banded Toeplitz matrix: valid 11-tap gaussian filter along W as a matmul."""
    wo = width - WIN + 1
    t = np.zeros((width, wo), dtype=np.float32)
    for j in range(wo):
        for k in range(WIN):
            t[j + k, j] = GAUSS[k]
    return jnp.asarray(t)


def _combined_loss_kernel(x_ref, y_ref, tap_ref, hist_ref, scal_ref):
    # x_ref / y_ref: (1, C, H, W) block for one batch element; tap_ref: (W, Wo)
    _, C, H, W = x_ref.shape
    Ho = H - WIN + 1
    Wo = W - WIN + 1
    RC = 8 if H % 8 == 0 else 1              # gray rows processed per histogram step

    x = x_ref[...][0]                        # (C, H, W)
    y = y_ref[...][0]

    # ---------------- L1 partial sum ------------------------------------------------
    l1_sum = jnp.sum(jnp.abs(x - y))

    # ---------------- SSIM partial sum ----------------------------------------------
    # Stack the five filter inputs and run the separable "valid" gaussian filter once.
    z = jnp.concatenate([x, y, x * x, y * y, x * y], axis=0)          # (5C, H, W)
    # W pass on the MXU: (5C*H, W) @ (W, Wo), f32 accumulation.
    aw = jnp.dot(z.reshape(5 * C * H, W), tap_ref[...],
                 preferred_element_type=jnp.float32)                  # (5C*H, Wo)
    aw = aw.reshape(5 * C, H, Wo)
    # H pass: 11-tap valid filter as unrolled sublane-shift FMAs.
    f = GAUSS[0] * aw[:, 0:Ho, :]
    for t in range(1, WIN):
        f = f + GAUSS[t] * aw[:, t:t + Ho, :]                         # (5C, Ho, Wo)

    mu1, mu2 = f[0:C], f[C:2 * C]
    s11 = f[2 * C:3 * C] - mu1 * mu1
    s22 = f[3 * C:4 * C] - mu2 * mu2
    s12 = f[4 * C:5 * C] - mu1 * mu2
    num = (2.0 * mu1 * mu2 + C1) * (2.0 * s12 + C2)
    den = (mu1 * mu1 + mu2 * mu2 + C1) * (s11 + s22 + C2)
    ssim_sum = jnp.sum(num / den)

    # ---------------- Histogram difference (radix-16 one-hots + MXU) -----------------
    # counts[hi, lo] accumulated as an A @ B^T contraction over pixels; GT pixels enter
    # with a negated lo one-hot so the result is (Npre - Ngt) per bin directly.
    bins16 = lax.broadcasted_iota(jnp.int32, (16, 1), 0)              # bins on sublanes

    def hist_body(cb, acc):
        h0 = pl.multiple_of(cb * RC, RC)
        gx = jnp.sum(x_ref[:, :, pl.ds(h0, RC), :], axis=(0, 1)) / float(C)   # (RC, W)
        gy = jnp.sum(y_ref[:, :, pl.ds(h0, RC), :], axis=(0, 1)) / float(C)
        ix = (gx * 255.0).astype(jnp.int32)     # trunc toward zero == torch .type(int)
        iy = (gy * 255.0).astype(jnp.int32)
        hix, lox = jnp.right_shift(ix, 4), jnp.bitwise_and(ix, 15)
        hiy, loy = jnp.right_shift(iy, 4), jnp.bitwise_and(iy, 15)
        lhs, rhs = [], []
        for r in range(RC):                    # 16-wide one-hots, pixels stay on lanes
            lhs.append((hix[r:r + 1, :] == bins16).astype(jnp.float32))   # (16, W)
            rhs.append((lox[r:r + 1, :] == bins16).astype(jnp.float32))
            lhs.append((hiy[r:r + 1, :] == bins16).astype(jnp.float32))
            rhs.append(-(loy[r:r + 1, :] == bins16).astype(jnp.float32))
        a_hi = jnp.concatenate(lhs, axis=1)                               # (16, 2*RC*W)
        b_lo = jnp.concatenate(rhs, axis=1)
        return acc + lax.dot_general(a_hi, b_lo, _NT,
                                     preferred_element_type=jnp.float32)  # (16, 16)

    cnt = lax.fori_loop(0, H // RC, hist_body, jnp.zeros((16, 16), jnp.float32))

    # ---------------- lane-dense per-block outputs -----------------------------------
    hist_ref[...] = cnt.reshape(1, 16, 16)                 # bin = hi*16 + lo
    lane = lax.broadcasted_iota(jnp.int32, (1, 1, 128), 2)
    scal_ref[...] = jnp.where(lane == 0, l1_sum,
                              jnp.where(lane == 1, ssim_sum, 0.0))


@functools.partial(jax.jit, static_argnames=("w",))
def combined_loss(pre, gt, w=0.2):
    B, C, H, W = pre.shape
    assert H >= WIN and W >= WIN, "spatial dims must be >= SSIM window (11)"
    Ho, Wo = H - WIN + 1, W - WIN + 1
    taps = _make_tap_matrix(W)                             # trace-time constant

    hist, scal = pl.pallas_call(
        _combined_loss_kernel,
        out_shape=(
            jax.ShapeDtypeStruct((B, 16, 16), jnp.float32),   # per-block (Npre-Ngt) counts
            jax.ShapeDtypeStruct((B, 1, 128), jnp.float32),   # lane0=L1 sum, lane1=SSIM sum
        ),
        grid_spec=pltpu.PrefetchScalarGridSpec(
            num_scalar_prefetch=0,
            grid=(B,),
            in_specs=[
                pl.BlockSpec((1, C, H, W), lambda b: (b, 0, 0, 0)),
                pl.BlockSpec((1, C, H, W), lambda b: (b, 0, 0, 0)),
                pl.BlockSpec((W, Wo), lambda b: (0, 0)),      # tap matrix, stays resident
            ],
            out_specs=[
                pl.BlockSpec((1, 16, 16), lambda b: (b, 0, 0)),
                pl.BlockSpec((1, 1, 128), lambda b: (b, 0, 0)),
            ],
        ),
        compiler_params=pltpu.CompilerParams(
            dimension_semantics=("parallel",),
            vmem_limit_bytes=64 * 1024 * 1024,
        ),
    )(pre.astype(jnp.float32), gt.astype(jnp.float32), taps)

    # ---- final (cheap) reductions / normalizations in JAX ----
    hist_diff = jnp.sum(hist, axis=0)                      # pooled over batch, like torch.histc
    hist_sq = jnp.sum(hist_diff * hist_diff)               # sum((Npre - Ngt)^2)
    l1_sum = jnp.sum(scal[:, 0, 0])
    ssim_sum = jnp.sum(scal[:, 0, 1])

    l1 = l1_sum / float(B * C * H * W)                     # nn.L1Loss (mean)
    ssim_mean = ssim_sum / float(B * C * Ho * Wo)          # ssim(..., size_average=True)
    l_loss = w * (hist_sq / float(B * H * W) / float(NBINS ** 2))
    return l1 + w * (1.0 - ssim_mean) + l_loss


if __name__ == "__main__":
    key = jax.random.PRNGKey(0)
    k1, k2 = jax.random.split(key)
    B, C, H, W = 2, 3, 16, 16                 # spatial > SSIM window (11)
    pre = jax.random.uniform(k1, (B, C, H, W), dtype=jnp.float32)
    gt = jax.random.uniform(k2, (B, C, H, W), dtype=jnp.float32)

    loss = combined_loss(pre, gt, w=0.2)
    jax.block_until_ready(loss)
    print("KERNEL_OK")
</pallas_src>

<mosaic_0001>
module attributes {stable_mosaic.version = 11 : i64} {
  func.func @_combined_loss_kernel(%arg0: i32, %arg1: memref<1x3x16x16xf32, #tpu.memory_space<vmem>>, %arg2: memref<1x3x16x16xf32, #tpu.memory_space<vmem>>, %arg3: memref<16x6xf32, #tpu.memory_space<vmem>>, %arg4: memref<1x16x16xf32, #tpu.memory_space<vmem>>, %arg5: memref<1x1x128xf32, #tpu.memory_space<vmem>>) attributes {dimension_semantics = [#tpu.dimension_semantics<parallel>], iteration_bounds = array<i64: 2>, scalar_prefetch = 0 : i64, scratch_operands = 0 : i64, tpu.core_type = #tpu.core_type<tc>, window_params = [{transform_indices = @transform_0, window_bounds = array<i64: 1, 3, 16, 16>}, {transform_indices = @transform_1, window_bounds = array<i64: 1, 3, 16, 16>}, {pipeline_mode = #tpu.pipeline_mode<synchronous>, transform_indices = @transform_2, window_bounds = array<i64: 16, 6>}, {transform_indices = @transform_3, window_bounds = array<i64: 1, 16, 16>}, {transform_indices = @transform_4, window_bounds = array<i64: 1, 1, 128>}]} {
    %c0 = arith.constant 0 : index
    %c0_0 = arith.constant 0 : index
    %c0_1 = arith.constant 0 : index
    %c0_2 = arith.constant 0 : index
    %0 = vector.load %arg1[%c0, %c0_0, %c0_1, %c0_2] : memref<1x3x16x16xf32, #tpu.memory_space<vmem>>, vector<1x3x16x16xf32>
    %1 = vector.shape_cast %0 : vector<1x3x16x16xf32> to vector<3x16x16xf32>
    %c0_3 = arith.constant 0 : index
    %c0_4 = arith.constant 0 : index
    %c0_5 = arith.constant 0 : index
    %c0_6 = arith.constant 0 : index
    %2 = vector.load %arg2[%c0_3, %c0_4, %c0_5, %c0_6] : memref<1x3x16x16xf32, #tpu.memory_space<vmem>>, vector<1x3x16x16xf32>
    %3 = vector.shape_cast %2 : vector<1x3x16x16xf32> to vector<3x16x16xf32>
    %4 = arith.subf %1, %3 : vector<3x16x16xf32>
    %5 = math.absf %4 : vector<3x16x16xf32>
    %6 = vector.shape_cast %5 : vector<3x16x16xf32> to vector<1x3x16x16xf32>
    %cst = arith.constant dense<0.000000e+00> : vector<1xf32>
    %7 = vector.multi_reduction <add>, %6, %cst [1, 2, 3] : vector<1x3x16x16xf32> to vector<1xf32>
    %8 = vector.shape_cast %7 : vector<1xf32> to vector<1x1x1x1xf32>
    %9 = vector.extract %8[0, 0, 0, 0] : f32 from vector<1x1x1x1xf32>
    %10 = arith.mulf %1, %1 : vector<3x16x16xf32>
    %11 = arith.mulf %3, %3 : vector<3x16x16xf32>
    %12 = arith.mulf %1, %3 : vector<3x16x16xf32>
    %13 = tpu.concatenate %1, %3, %10, %11, %12 in 0 : vector<3x16x16xf32>, vector<3x16x16xf32>, vector<3x16x16xf32>, vector<3x16x16xf32>, vector<3x16x16xf32> -> vector<15x16x16xf32>
    %14 = vector.shape_cast %13 : vector<15x16x16xf32> to vector<240x16xf32>
    %c0_7 = arith.constant 0 : index
    %c0_8 = arith.constant 0 : index
    %15 = vector.load %arg3[%c0_7, %c0_8] : memref<16x6xf32, #tpu.memory_space<vmem>>, vector<16x6xf32>
    %cst_9 = arith.constant dense<0.000000e+00> : vector<240x6xf32>
    %16 = tpu.matmul %14, %15, %cst_9 {dimension_numbers = #tpu.dot_dimension_numbers<[1], [0], [0], [1], [0, 0, 1, 1], [], []>} : vector<240x16xf32>, vector<16x6xf32>, vector<240x6xf32> -> vector<240x6xf32>
    %17 = vector.shape_cast %16 : vector<240x6xf32> to vector<15x16x6xf32>
    %18 = vector.extract_strided_slice %17 {offsets = [0, 0, 0], sizes = [15, 6, 6], strides = [1, 1, 1]} : vector<15x16x6xf32> to vector<15x6x6xf32>
    %cst_10 = arith.constant 0.00102838012 : f32
    %19 = vector.broadcast %cst_10 : f32 to vector<15x6x6xf32>
    %20 = arith.mulf %19, %18 : vector<15x6x6xf32>
    %21 = vector.extract_strided_slice %17 {offsets = [0, 1, 0], sizes = [15, 6, 6], strides = [1, 1, 1]} : vector<15x16x6xf32> to vector<15x6x6xf32>
    %cst_11 = arith.constant 0.00759875821 : f32
    %22 = vector.broadcast %cst_11 : f32 to vector<15x6x6xf32>
    %23 = arith.mulf %22, %21 : vector<15x6x6xf32>
    %24 = arith.addf %20, %23 : vector<15x6x6xf32>
    %25 = vector.extract_strided_slice %17 {offsets = [0, 2, 0], sizes = [15, 6, 6], strides = [1, 1, 1]} : vector<15x16x6xf32> to vector<15x6x6xf32>
    %cst_12 = arith.constant 0.0360007733 : f32
    %26 = vector.broadcast %cst_12 : f32 to vector<15x6x6xf32>
    %27 = arith.mulf %26, %25 : vector<15x6x6xf32>
    %28 = arith.addf %24, %27 : vector<15x6x6xf32>
    %29 = vector.extract_strided_slice %17 {offsets = [0, 3, 0], sizes = [15, 6, 6], strides = [1, 1, 1]} : vector<15x16x6xf32> to vector<15x6x6xf32>
    %cst_13 = arith.constant 0.109360687 : f32
    %30 = vector.broadcast %cst_13 : f32 to vector<15x6x6xf32>
    %31 = arith.mulf %30, %29 : vector<15x6x6xf32>
    %32 = arith.addf %28, %31 : vector<15x6x6xf32>
    %33 = vector.extract_strided_slice %17 {offsets = [0, 4, 0], sizes = [15, 6, 6], strides = [1, 1, 1]} : vector<15x16x6xf32> to vector<15x6x6xf32>
    %cst_14 = arith.constant 0.213005543 : f32
    %34 = vector.broadcast %cst_14 : f32 to vector<15x6x6xf32>
    %35 = arith.mulf %34, %33 : vector<15x6x6xf32>
    %36 = arith.addf %32, %35 : vector<15x6x6xf32>
    %37 = vector.extract_strided_slice %17 {offsets = [0, 5, 0], sizes = [15, 6, 6], strides = [1, 1, 1]} : vector<15x16x6xf32> to vector<15x6x6xf32>
    %cst_15 = arith.constant 0.266011715 : f32
    %38 = vector.broadcast %cst_15 : f32 to vector<15x6x6xf32>
    %39 = arith.mulf %38, %37 : vector<15x6x6xf32>
    %40 = arith.addf %36, %39 : vector<15x6x6xf32>
    %41 = vector.extract_strided_slice %17 {offsets = [0, 6, 0], sizes = [15, 6, 6], strides = [1, 1, 1]} : vector<15x16x6xf32> to vector<15x6x6xf32>
    %cst_16 = arith.constant 0.213005543 : f32
    %42 = vector.broadcast %cst_16 : f32 to vector<15x6x6xf32>
    %43 = arith.mulf %42, %41 : vector<15x6x6xf32>
    %44 = arith.addf %40, %43 : vector<15x6x6xf32>
    %45 = vector.extract_strided_slice %17 {offsets = [0, 7, 0], sizes = [15, 6, 6], strides = [1, 1, 1]} : vector<15x16x6xf32> to vector<15x6x6xf32>
    %cst_17 = arith.constant 0.109360687 : f32
    %46 = vector.broadcast %cst_17 : f32 to vector<15x6x6xf32>
    %47 = arith.mulf %46, %45 : vector<15x6x6xf32>
    %48 = arith.addf %44, %47 : vector<15x6x6xf32>
    %49 = vector.extract_strided_slice %17 {offsets = [0, 8, 0], sizes = [15, 6, 6], strides = [1, 1, 1]} : vector<15x16x6xf32> to vector<15x6x6xf32>
    %cst_18 = arith.constant 0.0360007733 : f32
    %50 = vector.broadcast %cst_18 : f32 to vector<15x6x6xf32>
    %51 = arith.mulf %50, %49 : vector<15x6x6xf32>
    %52 = arith.addf %48, %51 : vector<15x6x6xf32>
    %53 = vector.extract_strided_slice %17 {offsets = [0, 9, 0], sizes = [15, 6, 6], strides = [1, 1, 1]} : vector<15x16x6xf32> to vector<15x6x6xf32>
    %cst_19 = arith.constant 0.00759875821 : f32
    %54 = vector.broadcast %cst_19 : f32 to vector<15x6x6xf32>
    %55 = arith.mulf %54, %53 : vector<15x6x6xf32>
    %56 = arith.addf %52, %55 : vector<15x6x6xf32>
    %57 = vector.extract_strided_slice %17 {offsets = [0, 10, 0], sizes = [15, 6, 6], strides = [1, 1, 1]} : vector<15x16x6xf32> to vector<15x6x6xf32>
    %cst_20 = arith.constant 0.00102838012 : f32
    %58 = vector.broadcast %cst_20 : f32 to vector<15x6x6xf32>
    %59 = arith.mulf %58, %57 : vector<15x6x6xf32>
    %60 = arith.addf %56, %59 : vector<15x6x6xf32>
    %61 = vector.extract_strided_slice %60 {offsets = [0, 0, 0], sizes = [3, 6, 6], strides = [1, 1, 1]} : vector<15x6x6xf32> to vector<3x6x6xf32>
    %62 = vector.extract_strided_slice %60 {offsets = [3, 0, 0], sizes = [3, 6, 6], strides = [1, 1, 1]} : vector<15x6x6xf32> to vector<3x6x6xf32>
    %63 = vector.extract_strided_slice %60 {offsets = [6, 0, 0], sizes = [3, 6, 6], strides = [1, 1, 1]} : vector<15x6x6xf32> to vector<3x6x6xf32>
    %64 = arith.mulf %61, %61 : vector<3x6x6xf32>
    %65 = arith.subf %63, %64 : vector<3x6x6xf32>
    %66 = vector.extract_strided_slice %60 {offsets = [9, 0, 0], sizes = [3, 6, 6], strides = [1, 1, 1]} : vector<15x6x6xf32> to vector<3x6x6xf32>
    %67 = arith.mulf %62, %62 : vector<3x6x6xf32>
    %68 = arith.subf %66, %67 : vector<3x6x6xf32>
    %69 = vector.extract_strided_slice %60 {offsets = [12, 0, 0], sizes = [3, 6, 6], strides = [1, 1, 1]} : vector<15x6x6xf32> to vector<3x6x6xf32>
    %70 = arith.mulf %61, %62 : vector<3x6x6xf32>
    %71 = arith.subf %69, %70 : vector<3x6x6xf32>
    %cst_21 = arith.constant 2.000000e+00 : f32
    %72 = vector.broadcast %cst_21 : f32 to vector<3x6x6xf32>
    %73 = arith.mulf %72, %61 : vector<3x6x6xf32>
    %74 = arith.mulf %73, %62 : vector<3x6x6xf32>
    %cst_22 = arith.constant 9.99999974E-5 : f32
    %75 = vector.broadcast %cst_22 : f32 to vector<3x6x6xf32>
    %76 = arith.addf %74, %75 : vector<3x6x6xf32>
    %cst_23 = arith.constant 2.000000e+00 : f32
    %77 = vector.broadcast %cst_23 : f32 to vector<3x6x6xf32>
    %78 = arith.mulf %77, %71 : vector<3x6x6xf32>
    %cst_24 = arith.constant 8.99999984E-4 : f32
    %79 = vector.broadcast %cst_24 : f32 to vector<3x6x6xf32>
    %80 = arith.addf %78, %79 : vector<3x6x6xf32>
    %81 = arith.mulf %76, %80 : vector<3x6x6xf32>
    %82 = arith.mulf %61, %61 : vector<3x6x6xf32>
    %83 = arith.mulf %62, %62 : vector<3x6x6xf32>
    %84 = arith.addf %82, %83 : vector<3x6x6xf32>
    %cst_25 = arith.constant 9.99999974E-5 : f32
    %85 = vector.broadcast %cst_25 : f32 to vector<3x6x6xf32>
    %86 = arith.addf %84, %85 : vector<3x6x6xf32>
    %87 = arith.addf %65, %68 : vector<3x6x6xf32>
    %cst_26 = arith.constant 8.99999984E-4 : f32
    %88 = vector.broadcast %cst_26 : f32 to vector<3x6x6xf32>
    %89 = arith.addf %87, %88 : vector<3x6x6xf32>
    %90 = arith.mulf %86, %89 : vector<3x6x6xf32>
    %91 = arith.divf %81, %90 : vector<3x6x6xf32>
    %92 = vector.shape_cast %91 : vector<3x6x6xf32> to vector<1x3x6x6xf32>
    %cst_27 = arith.constant dense<0.000000e+00> : vector<1xf32>
    %93 = vector.multi_reduction <add>, %92, %cst_27 [1, 2, 3] : vector<1x3x6x6xf32> to vector<1xf32>
    %94 = vector.shape_cast %93 : vector<1xf32> to vector<1x1x1x1xf32>
    %95 = vector.extract %94[0, 0, 0, 0] : f32 from vector<1x1x1x1xf32>
    %96 = tpu.iota {dimensions = array<i32: 0>} : vector<16x1xi32>
    %cst_28 = arith.constant 0.000000e+00 : f32
    %97 = vector.broadcast %cst_28 : f32 to vector<16x16xf32>
    %c0_i32 = arith.constant 0 : i32
    %c2_i32 = arith.constant 2 : i32
    %98 = arith.addi %c0_i32, %c2_i32 : i32
    %c1_i32 = arith.constant 1 : i32
    %99 = scf.for %arg6 = %c0_i32 to %98 step %c1_i32 iter_args(%arg7 = %97) -> (vector<16x16xf32>)  : i32 {
      %c8_i32 = arith.constant 8 : i32
      %113 = arith.muli %arg6, %c8_i32 : i32
      %114 = tpu.assume_multiple %113, 8 : i32
      %c0_39 = arith.constant 0 : index
      %c0_40 = arith.constant 0 : index
      %115 = arith.index_cast %114 : i32 to index
      %c0_41 = arith.constant 0 : index
      %116 = vector.load %arg1[%c0_39, %c0_40, %115, %c0_41] : memref<1x3x16x16xf32, #tpu.memory_space<vmem>>, vector<1x3x8x16xf32>
      %cst_42 = arith.constant dense<0.000000e+00> : vector<8x16xf32>
      %117 = vector.multi_reduction <add>, %116, %cst_42 [0, 1] : vector<1x3x8x16xf32> to vector<8x16xf32>
      %cst_43 = arith.constant 3.000000e+00 : f32
      %118 = vector.broadcast %cst_43 : f32 to vector<8x16xf32>
      %119 = arith.divf %117, %118 : vector<8x16xf32>
      %c0_44 = arith.constant 0 : index
      %c0_45 = arith.constant 0 : index
      %120 = arith.index_cast %114 : i32 to index
      %c0_46 = arith.constant 0 : index
      %121 = vector.load %arg2[%c0_44, %c0_45, %120, %c0_46] : memref<1x3x16x16xf32, #tpu.memory_space<vmem>>, vector<1x3x8x16xf32>
      %cst_47 = arith.constant dense<0.000000e+00> : vector<8x16xf32>
      %122 = vector.multi_reduction <add>, %121, %cst_47 [0, 1] : vector<1x3x8x16xf32> to vector<8x16xf32>
      %cst_48 = arith.constant 3.000000e+00 : f32
      %123 = vector.broadcast %cst_48 : f32 to vector<8x16xf32>
      %124 = arith.divf %122, %123 : vector<8x16xf32>
      %cst_49 = arith.constant 2.550000e+02 : f32
      %125 = vector.broadcast %cst_49 : f32 to vector<8x16xf32>
      %126 = arith.mulf %119, %125 : vector<8x16xf32>
      %127 = arith.fptosi %126 : vector<8x16xf32> to vector<8x16xi32>
      %cst_50 = arith.constant 2.550000e+02 : f32
      %128 = vector.broadcast %cst_50 : f32 to vector<8x16xf32>
      %129 = arith.mulf %124, %128 : vector<8x16xf32>
      %130 = arith.fptosi %129 : vector<8x16xf32> to vector<8x16xi32>
      %c4_i32 = arith.constant 4 : i32
      %131 = vector.broadcast %c4_i32 : i32 to vector<8x16xi32>
      %132 = arith.shrsi %127, %131 : vector<8x16xi32>
      %c15_i32 = arith.constant 15 : i32
      %133 = vector.broadcast %c15_i32 : i32 to vector<8x16xi32>
      %134 = arith.andi %127, %133 : vector<8x16xi32>
      %c4_i32_51 = arith.constant 4 : i32
      %135 = vector.broadcast %c4_i32_51 : i32 to vector<8x16xi32>
      %136 = arith.shrsi %130, %135 : vector<8x16xi32>
      %c15_i32_52 = arith.constant 15 : i32
      %137 = vector.broadcast %c15_i32_52 : i32 to vector<8x16xi32>
      %138 = arith.andi %130, %137 : vector<8x16xi32>
      %139 = vector.extract_strided_slice %132 {offsets = [0, 0], sizes = [1, 16], strides = [1, 1]} : vector<8x16xi32> to vector<1x16xi32>
      %140 = vector.broadcast %139 : vector<1x16xi32> to vector<16x16xi32>
      %141 = vector.broadcast %96 : vector<16x1xi32> to vector<16x16xi32>
      %142 = arith.cmpi eq, %140, %141 : vector<16x16xi32>
      %143 = arith.extui %142 : vector<16x16xi1> to vector<16x16xi32>
      %144 = arith.sitofp %143 : vector<16x16xi32> to vector<16x16xf32>
      %145 = vector.extract_strided_slice %134 {offsets = [0, 0], sizes = [1, 16], strides = [1, 1]} : vector<8x16xi32> to vector<1x16xi32>
      %146 = vector.broadcast %145 : vector<1x16xi32> to vector<16x16xi32>
      %147 = vector.broadcast %96 : vector<16x1xi32> to vector<16x16xi32>
      %148 = arith.cmpi eq, %146, %147 : vector<16x16xi32>
      %149 = arith.extui %148 : vector<16x16xi1> to vector<16x16xi32>
      %150 = arith.sitofp %149 : vector<16x16xi32> to vector<16x16xf32>
      %151 = vector.extract_strided_slice %136 {offsets = [0, 0], sizes = [1, 16], strides = [1, 1]} : vector<8x16xi32> to vector<1x16xi32>
      %152 = vector.broadcast %151 : vector<1x16xi32> to vector<16x16xi32>
      %153 = vector.broadcast %96 : vector<16x1xi32> to vector<16x16xi32>
      %154 = arith.cmpi eq, %152, %153 : vector<16x16xi32>
      %155 = arith.extui %154 : vector<16x16xi1> to vector<16x16xi32>
      %156 = arith.sitofp %155 : vector<16x16xi32> to vector<16x16xf32>
      %157 = vector.extract_strided_slice %138 {offsets = [0, 0], sizes = [1, 16], strides = [1, 1]} : vector<8x16xi32> to vector<1x16xi32>
      %158 = vector.broadcast %157 : vector<1x16xi32> to vector<16x16xi32>
      %159 = vector.broadcast %96 : vector<16x1xi32> to vector<16x16xi32>
      %160 = arith.cmpi eq, %158, %159 : vector<16x16xi32>
      %161 = arith.extui %160 : vector<16x16xi1> to vector<16x16xi32>
      %162 = arith.sitofp %161 : vector<16x16xi32> to vector<16x16xf32>
      %cst_53 = arith.constant 0.000000e+00 : f32
      %163 = vector.broadcast %cst_53 : f32 to vector<16x16xf32>
      %164 = arith.subf %163, %162 : vector<16x16xf32>
      %165 = vector.extract_strided_slice %132 {offsets = [1, 0], sizes = [1, 16], strides = [1, 1]} : vector<8x16xi32> to vector<1x16xi32>
      %166 = vector.broadcast %165 : vector<1x16xi32> to vector<16x16xi32>
      %167 = vector.broadcast %96 : vector<16x1xi32> to vector<16x16xi32>
      %168 = arith.cmpi eq, %166, %167 : vector<16x16xi32>
      %169 = arith.extui %168 : vector<16x16xi1> to vector<16x16xi32>
      %170 = arith.sitofp %169 : vector<16x16xi32> to vector<16x16xf32>
      %171 = vector.extract_strided_slice %134 {offsets = [1, 0], sizes = [1, 16], strides = [1, 1]} : vector<8x16xi32> to vector<1x16xi32>
      %172 = vector.broadcast %171 : vector<1x16xi32> to vector<16x16xi32>
      %173 = vector.broadcast %96 : vector<16x1xi32> to vector<16x16xi32>
      %174 = arith.cmpi eq, %172, %173 : vector<16x16xi32>
      %175 = arith.extui %174 : vector<16x16xi1> to vector<16x16xi32>
      %176 = arith.sitofp %175 : vector<16x16xi32> to vector<16x16xf32>
      %177 = vector.extract_strided_slice %136 {offsets = [1, 0], sizes = [1, 16], strides = [1, 1]} : vector<8x16xi32> to vector<1x16xi32>
      %178 = vector.broadcast %177 : vector<1x16xi32> to vector<16x16xi32>
      %179 = vector.broadcast %96 : vector<16x1xi32> to vector<16x16xi32>
      %180 = arith.cmpi eq, %178, %179 : vector<16x16xi32>
      %181 = arith.extui %180 : vector<16x16xi1> to vector<16x16xi32>
      %182 = arith.sitofp %181 : vector<16x16xi32> to vector<16x16xf32>
      %183 = vector.extract_strided_slice %138 {offsets = [1, 0], sizes = [1, 16], strides = [1, 1]} : vector<8x16xi32> to vector<1x16xi32>
      %184 = vector.broadcast %183 : vector<1x16xi32> to vector<16x16xi32>
      %185 = vector.broadcast %96 : vector<16x1xi32> to vector<16x16xi32>
      %186 = arith.cmpi eq, %184, %185 : vector<16x16xi32>
      %187 = arith.extui %186 : vector<16x16xi1> to vector<16x16xi32>
      %188 = arith.sitofp %187 : vector<16x16xi32> to vector<16x16xf32>
      %cst_54 = arith.constant 0.000000e+00 : f32
      %189 = vector.broadcast %cst_54 : f32 to vector<16x16xf32>
      %190 = arith.subf %189, %188 : vector<16x16xf32>
      %191 = vector.extract_strided_slice %132 {offsets = [2, 0], sizes = [1, 16], strides = [1, 1]} : vector<8x16xi32> to vector<1x16xi32>
      %192 = vector.broadcast %191 : vector<1x16xi32> to vector<16x16xi32>
      %193 = vector.broadcast %96 : vector<16x1xi32> to vector<16x16xi32>
      %194 = arith.cmpi eq, %192, %193 : vector<16x16xi32>
      %195 = arith.extui %194 : vector<16x16xi1> to vector<16x16xi32>
      %196 = arith.sitofp %195 : vector<16x16xi32> to vector<16x16xf32>
      %197 = vector.extract_strided_slice %134 {offsets = [2, 0], sizes = [1, 16], strides = [1, 1]} : vector<8x16xi32> to vector<1x16xi32>
      %198 = vector.broadcast %197 : vector<1x16xi32> to vector<16x16xi32>
      %199 = vector.broadcast %96 : vector<16x1xi32> to vector<16x16xi32>
      %200 = arith.cmpi eq, %198, %199 : vector<16x16xi32>
      %201 = arith.extui %200 : vector<16x16xi1> to vector<16x16xi32>
      %202 = arith.sitofp %201 : vector<16x16xi32> to vector<16x16xf32>
      %203 = vector.extract_strided_slice %136 {offsets = [2, 0], sizes = [1, 16], strides = [1, 1]} : vector<8x16xi32> to vector<1x16xi32>
      %204 = vector.broadcast %203 : vector<1x16xi32> to vector<16x16xi32>
      %205 = vector.broadcast %96 : vector<16x1xi32> to vector<16x16xi32>
      %206 = arith.cmpi eq, %204, %205 : vector<16x16xi32>
      %207 = arith.extui %206 : vector<16x16xi1> to vector<16x16xi32>
      %208 = arith.sitofp %207 : vector<16x16xi32> to vector<16x16xf32>
      %209 = vector.extract_strided_slice %138 {offsets = [2, 0], sizes = [1, 16], strides = [1, 1]} : vector<8x16xi32> to vector<1x16xi32>
      %210 = vector.broadcast %209 : vector<1x16xi32> to vector<16x16xi32>
      %211 = vector.broadcast %96 : vector<16x1xi32> to vector<16x16xi32>
      %212 = arith.cmpi eq, %210, %211 : vector<16x16xi32>
      %213 = arith.extui %212 : vector<16x16xi1> to vector<16x16xi32>
      %214 = arith.sitofp %213 : vector<16x16xi32> to vector<16x16xf32>
      %cst_55 = arith.constant 0.000000e+00 : f32
      %215 = vector.broadcast %cst_55 : f32 to vector<16x16xf32>
      %216 = arith.subf %215, %214 : vector<16x16xf32>
      %217 = vector.extract_strided_slice %132 {offsets = [3, 0], sizes = [1, 16], strides = [1, 1]} : vector<8x16xi32> to vector<1x16xi32>
      %218 = vector.broadcast %217 : vector<1x16xi32> to vector<16x16xi32>
      %219 = vector.broadcast %96 : vector<16x1xi32> to vector<16x16xi32>
      %220 = arith.cmpi eq, %218, %219 : vector<16x16xi32>
      %221 = arith.extui %220 : vector<16x16xi1> to vector<16x16xi32>
      %222 = arith.sitofp %221 : vector<16x16xi32> to vector<16x16xf32>
      %223 = vector.extract_strided_slice %134 {offsets = [3, 0], sizes = [1, 16], strides = [1, 1]} : vector<8x16xi32> to vector<1x16xi32>
      %224 = vector.broadcast %223 : vector<1x16xi32> to vector<16x16xi32>
      %225 = vector.broadcast %96 : vector<16x1xi32> to vector<16x16xi32>
      %226 = arith.cmpi eq, %224, %225 : vector<16x16xi32>
      %227 = arith.extui %226 : vector<16x16xi1> to vector<16x16xi32>
      %228 = arith.sitofp %227 : vector<16x16xi32> to vector<16x16xf32>
      %229 = vector.extract_strided_slice %136 {offsets = [3, 0], sizes = [1, 16], strides = [1, 1]} : vector<8x16xi32> to vector<1x16xi32>
      %230 = vector.broadcast %229 : vector<1x16xi32> to vector<16x16xi32>
      %231 = vector.broadcast %96 : vector<16x1xi32> to vector<16x16xi32>
      %232 = arith.cmpi eq, %230, %231 : vector<16x16xi32>
      %233 = arith.extui %232 : vector<16x16xi1> to vector<16x16xi32>
      %234 = arith.sitofp %233 : vector<16x16xi32> to vector<16x16xf32>
      %235 = vector.extract_strided_slice %138 {offsets = [3, 0], sizes = [1, 16], strides = [1, 1]} : vector<8x16xi32> to vector<1x16xi32>
      %236 = vector.broadcast %235 : vector<1x16xi32> to vector<16x16xi32>
      %237 = vector.broadcast %96 : vector<16x1xi32> to vector<16x16xi32>
      %238 = arith.cmpi eq, %236, %237 : vector<16x16xi32>
      %239 = arith.extui %238 : vector<16x16xi1> to vector<16x16xi32>
      %240 = arith.sitofp %239 : vector<16x16xi32> to vector<16x16xf32>
      %cst_56 = arith.constant 0.000000e+00 : f32
      %241 = vector.broadcast %cst_56 : f32 to vector<16x16xf32>
      %242 = arith.subf %241, %240 : vector<16x16xf32>
      %243 = vector.extract_strided_slice %132 {offsets = [4, 0], sizes = [1, 16], strides = [1, 1]} : vector<8x16xi32> to vector<1x16xi32>
      %244 = vector.broadcast %243 : vector<1x16xi32> to vector<16x16xi32>
      %245 = vector.broadcast %96 : vector<16x1xi32> to vector<16x16xi32>
      %246 = arith.cmpi eq, %244, %245 : vector<16x16xi32>
      %247 = arith.extui %246 : vector<16x16xi1> to vector<16x16xi32>
      %248 = arith.sitofp %247 : vector<16x16xi32> to vector<16x16xf32>
      %249 = vector.extract_strided_slice %134 {offsets = [4, 0], sizes = [1, 16], strides = [1, 1]} : vector<8x16xi32> to vector<1x16xi32>
      %250 = vector.broadcast %249 : vector<1x16xi32> to vector<16x16xi32>
      %251 = vector.broadcast %96 : vector<16x1xi32> to vector<16x16xi32>
      %252 = arith.cmpi eq, %250, %251 : vector<16x16xi32>
      %253 = arith.extui %252 : vector<16x16xi1> to vector<16x16xi32>
      %254 = arith.sitofp %253 : vector<16x16xi32> to vector<16x16xf32>
      %255 = vector.extract_strided_slice %136 {offsets = [4, 0], sizes = [1, 16], strides = [1, 1]} : vector<8x16xi32> to vector<1x16xi32>
      %256 = vector.broadcast %255 : vector<1x16xi32> to vector<16x16xi32>
      %257 = vector.broadcast %96 : vector<16x1xi32> to vector<16x16xi32>
      %258 = arith.cmpi eq, %256, %257 : vector<16x16xi32>
      %259 = arith.extui %258 : vector<16x16xi1> to vector<16x16xi32>
      %260 = arith.sitofp %259 : vector<16x16xi32> to vector<16x16xf32>
      %261 = vector.extract_strided_slice %138 {offsets = [4, 0], sizes = [1, 16], strides = [1, 1]} : vector<8x16xi32> to vector<1x16xi32>
      %262 = vector.broadcast %261 : vector<1x16xi32> to vector<16x16xi32>
      %263 = vector.broadcast %96 : vector<16x1xi32> to vector<16x16xi32>
      %264 = arith.cmpi eq, %262, %263 : vector<16x16xi32>
      %265 = arith.extui %264 : vector<16x16xi1> to vector<16x16xi32>
      %266 = arith.sitofp %265 : vector<16x16xi32> to vector<16x16xf32>
      %cst_57 = arith.constant 0.000000e+00 : f32
      %267 = vector.broadcast %cst_57 : f32 to vector<16x16xf32>
      %268 = arith.subf %267, %266 : vector<16x16xf32>
      %269 = vector.extract_strided_slice %132 {offsets = [5, 0], sizes = [1, 16], strides = [1, 1]} : vector<8x16xi32> to vector<1x16xi32>
      %270 = vector.broadcast %269 : vector<1x16xi32> to vector<16x16xi32>
      %271 = vector.broadcast %96 : vector<16x1xi32> to vector<16x16xi32>
      %272 = arith.cmpi eq, %270, %271 : vector<16x16xi32>
      %273 = arith.extui %272 : vector<16x16xi1> to vector<16x16xi32>
      %274 = arith.sitofp %273 : vector<16x16xi32> to vector<16x16xf32>
      %275 = vector.extract_strided_slice %134 {offsets = [5, 0], sizes = [1, 16], strides = [1, 1]} : vector<8x16xi32> to vector<1x16xi32>
      %276 = vector.broadcast %275 : vector<1x16xi32> to vector<16x16xi32>
      %277 = vector.broadcast %96 : vector<16x1xi32> to vector<16x16xi32>
      %278 = arith.cmpi eq, %276, %277 : vector<16x16xi32>
      %279 = arith.extui %278 : vector<16x16xi1> to vector<16x16xi32>
      %280 = arith.sitofp %279 : vector<16x16xi32> to vector<16x16xf32>
      %281 = vector.extract_strided_slice %136 {offsets = [5, 0], sizes = [1, 16], strides = [1, 1]} : vector<8x16xi32> to vector<1x16xi32>
      %282 = vector.broadcast %281 : vector<1x16xi32> to vector<16x16xi32>
      %283 = vector.broadcast %96 : vector<16x1xi32> to vector<16x16xi32>
      %284 = arith.cmpi eq, %282, %283 : vector<16x16xi32>
      %285 = arith.extui %284 : vector<16x16xi1> to vector<16x16xi32>
      %286 = arith.sitofp %285 : vector<16x16xi32> to vector<16x16xf32>
      %287 = vector.extract_strided_slice %138 {offsets = [5, 0], sizes = [1, 16], strides = [1, 1]} : vector<8x16xi32> to vector<1x16xi32>
      %288 = vector.broadcast %287 : vector<1x16xi32> to vector<16x16xi32>
      %289 = vector.broadcast %96 : vector<16x1xi32> to vector<16x16xi32>
      %290 = arith.cmpi eq, %288, %289 : vector<16x16xi32>
      %291 = arith.extui %290 : vector<16x16xi1> to vector<16x16xi32>
      %292 = arith.sitofp %291 : vector<16x16xi32> to vector<16x16xf32>
      %cst_58 = arith.constant 0.000000e+00 : f32
      %293 = vector.broadcast %cst_58 : f32 to vector<16x16xf32>
      %294 = arith.subf %293, %292 : vector<16x16xf32>
      %295 = vector.extract_strided_slice %132 {offsets = [6, 0], sizes = [1, 16], strides = [1, 1]} : vector<8x16xi32> to vector<1x16xi32>
      %296 = vector.broadcast %295 : vector<1x16xi32> to vector<16x16xi32>
      %297 = vector.broadcast %96 : vector<16x1xi32> to vector<16x16xi32>
      %298 = arith.cmpi eq, %296, %297 : vector<16x16xi32>
      %299 = arith.extui %298 : vector<16x16xi1> to vector<16x16xi32>
      %300 = arith.sitofp %299 : vector<16x16xi32> to vector<16x16xf32>
      %301 = vector.extract_strided_slice %134 {offsets = [6, 0], sizes = [1, 16], strides = [1, 1]} : vector<8x16xi32> to vector<1x16xi32>
      %302 = vector.broadcast %301 : vector<1x16xi32> to vector<16x16xi32>
      %303 = vector.broadcast %96 : vector<16x1xi32> to vector<16x16xi32>
      %304 = arith.cmpi eq, %302, %303 : vector<16x16xi32>
      %305 = arith.extui %304 : vector<16x16xi1> to vector<16x16xi32>
      %306 = arith.sitofp %305 : vector<16x16xi32> to vector<16x16xf32>
      %307 = vector.extract_strided_slice %136 {offsets = [6, 0], sizes = [1, 16], strides = [1, 1]} : vector<8x16xi32> to vector<1x16xi32>
      %308 = vector.broadcast %307 : vector<1x16xi32> to vector<16x16xi32>
      %309 = vector.broadcast %96 : vector<16x1xi32> to vector<16x16xi32>
      %310 = arith.cmpi eq, %308, %309 : vector<16x16xi32>
      %311 = arith.extui %310 : vector<16x16xi1> to vector<16x16xi32>
      %312 = arith.sitofp %311 : vector<16x16xi32> to vector<16x16xf32>
      %313 = vector.extract_strided_slice %138 {offsets = [6, 0], sizes = [1, 16], strides = [1, 1]} : vector<8x16xi32> to vector<1x16xi32>
      %314 = vector.broadcast %313 : vector<1x16xi32> to vector<16x16xi32>
      %315 = vector.broadcast %96 : vector<16x1xi32> to vector<16x16xi32>
      %316 = arith.cmpi eq, %314, %315 : vector<16x16xi32>
      %317 = arith.extui %316 : vector<16x16xi1> to vector<16x16xi32>
      %318 = arith.sitofp %317 : vector<16x16xi32> to vector<16x16xf32>
      %cst_59 = arith.constant 0.000000e+00 : f32
      %319 = vector.broadcast %cst_59 : f32 to vector<16x16xf32>
      %320 = arith.subf %319, %318 : vector<16x16xf32>
      %321 = vector.extract_strided_slice %132 {offsets = [7, 0], sizes = [1, 16], strides = [1, 1]} : vector<8x16xi32> to vector<1x16xi32>
      %322 = vector.broadcast %321 : vector<1x16xi32> to vector<16x16xi32>
      %323 = vector.broadcast %96 : vector<16x1xi32> to vector<16x16xi32>
      %324 = arith.cmpi eq, %322, %323 : vector<16x16xi32>
      %325 = arith.extui %324 : vector<16x16xi1> to vector<16x16xi32>
      %326 = arith.sitofp %325 : vector<16x16xi32> to vector<16x16xf32>
      %327 = vector.extract_strided_slice %134 {offsets = [7, 0], sizes = [1, 16], strides = [1, 1]} : vector<8x16xi32> to vector<1x16xi32>
      %328 = vector.broadcast %327 : vector<1x16xi32> to vector<16x16xi32>
      %329 = vector.broadcast %96 : vector<16x1xi32> to vector<16x16xi32>
      %330 = arith.cmpi eq, %328, %329 : vector<16x16xi32>
      %331 = arith.extui %330 : vector<16x16xi1> to vector<16x16xi32>
      %332 = arith.sitofp %331 : vector<16x16xi32> to vector<16x16xf32>
      %333 = vector.extract_strided_slice %136 {offsets = [7, 0], sizes = [1, 16], strides = [1, 1]} : vector<8x16xi32> to vector<1x16xi32>
      %334 = vector.broadcast %333 : vector<1x16xi32> to vector<16x16xi32>
      %335 = vector.broadcast %96 : vector<16x1xi32> to vector<16x16xi32>
      %336 = arith.cmpi eq, %334, %335 : vector<16x16xi32>
      %337 = arith.extui %336 : vector<16x16xi1> to vector<16x16xi32>
      %338 = arith.sitofp %337 : vector<16x16xi32> to vector<16x16xf32>
      %339 = vector.extract_strided_slice %138 {offsets = [7, 0], sizes = [1, 16], strides = [1, 1]} : vector<8x16xi32> to vector<1x16xi32>
      %340 = vector.broadcast %339 : vector<1x16xi32> to vector<16x16xi32>
      %341 = vector.broadcast %96 : vector<16x1xi32> to vector<16x16xi32>
      %342 = arith.cmpi eq, %340, %341 : vector<16x16xi32>
      %343 = arith.extui %342 : vector<16x16xi1> to vector<16x16xi32>
      %344 = arith.sitofp %343 : vector<16x16xi32> to vector<16x16xf32>
      %cst_60 = arith.constant 0.000000e+00 : f32
      %345 = vector.broadcast %cst_60 : f32 to vector<16x16xf32>
      %346 = arith.subf %345, %344 : vector<16x16xf32>
      %347 = tpu.concatenate %144, %156, %170, %182, %196, %208, %222, %234, %248, %260, %274, %286, %300, %312, %326, %338 in 1 : vector<16x16xf32>, vector<16x16xf32>, vector<16x16xf32>, vector<16x16xf32>, vector<16x16xf32>, vector<16x16xf32>, vector<16x16xf32>, vector<16x16xf32>, vector<16x16xf32>, vector<16x16xf32>, vector<16x16xf32>, vector<16x16xf32>, vector<16x16xf32>, vector<16x16xf32>, vector<16x16xf32>, vector<16x16xf32> -> vector<16x256xf32>
      %348 = tpu.concatenate %150, %164, %176, %190, %202, %216, %228, %242, %254, %268, %280, %294, %306, %320, %332, %346 in 1 : vector<16x16xf32>, vector<16x16xf32>, vector<16x16xf32>, vector<16x16xf32>, vector<16x16xf32>, vector<16x16xf32>, vector<16x16xf32>, vector<16x16xf32>, vector<16x16xf32>, vector<16x16xf32>, vector<16x16xf32>, vector<16x16xf32>, vector<16x16xf32>, vector<16x16xf32>, vector<16x16xf32>, vector<16x16xf32> -> vector<16x256xf32>
      %cst_61 = arith.constant dense<0.000000e+00> : vector<16x16xf32>
      %349 = tpu.matmul %347, %348, %cst_61 {dimension_numbers = #tpu.dot_dimension_numbers<[1], [1], [0], [0], [0, 0, 1, 0], [], []>} : vector<16x256xf32>, vector<16x256xf32>, vector<16x16xf32> -> vector<16x16xf32>
      %350 = arith.addf %arg7, %349 : vector<16x16xf32>
      scf.yield %350 : vector<16x16xf32>
    }
    %c2_i32_29 = arith.constant 2 : i32
    %100 = vector.shape_cast %99 : vector<16x16xf32> to vector<1x16x16xf32>
    %c0_30 = arith.constant 0 : index
    %c0_31 = arith.constant 0 : index
    %c0_32 = arith.constant 0 : index
    %101 = vector.load %arg4[%c0_30, %c0_31, %c0_32] : memref<1x16x16xf32, #tpu.memory_space<vmem>>, vector<1x16x16xf32>
    tpu.vector_store %arg4[%c0_30, %c0_31, %c0_32], %100 {strides = array<i32>} : memref<1x16x16xf32, #tpu.memory_space<vmem>>, vector<1x16x16xf32>,
    %102 = tpu.iota {dimensions = array<i32: 2>} : vector<1x1x128xi32>
    %c0_i32_33 = arith.constant 0 : i32
    %103 = vector.broadcast %c0_i32_33 : i32 to vector<1x1x128xi32>
    %104 = arith.cmpi eq, %102, %103 : vector<1x1x128xi32>
    %c1_i32_34 = arith.constant 1 : i32
    %105 = vector.broadcast %c1_i32_34 : i32 to vector<1x1x128xi32>
    %106 = arith.cmpi eq, %102, %105 : vector<1x1x128xi32>
    %cst_35 = arith.constant 0.000000e+00 : f32
    %107 = vector.broadcast %95 : f32 to vector<1x1x128xf32>
    %108 = vector.broadcast %cst_35 : f32 to vector<1x1x128xf32>
    %109 = arith.select %106, %107, %108 : vector<1x1x128xi1>, vector<1x1x128xf32>
    %110 = vector.broadcast %9 : f32 to vector<1x1x128xf32>
    %111 = arith.select %104, %110, %109 : vector<1x1x128xi1>, vector<1x1x128xf32>
    %c0_36 = arith.constant 0 : index
    %c0_37 = arith.constant 0 : index
    %c0_38 = arith.constant 0 : index
    %112 = vector.load %arg5[%c0_36, %c0_37, %c0_38] : memref<1x1x128xf32, #tpu.memory_space<vmem>>, vector<1x1x128xf32>
    tpu.vector_store %arg5[%c0_36, %c0_37, %c0_38], %111 {strides = array<i32>} : memref<1x1x128xf32, #tpu.memory_space<vmem>>, vector<1x1x128xf32>,
    return
  }
  func.func @transform_0(%arg0: i32) -> (i32, i32, i32, i32) {
    %c0_i32 = arith.constant 0 : i32
    %c0_i32_0 = arith.constant 0 : i32
    %c0_i32_1 = arith.constant 0 : i32
    %c0_i32_2 = arith.constant 0 : i32
    return %arg0, %c0_i32, %c0_i32_0, %c0_i32_1 : i32, i32, i32, i32
  }
  func.func @transform_1(%arg0: i32) -> (i32, i32, i32, i32) {
    %c0_i32 = arith.constant 0 : i32
    %c0_i32_0 = arith.constant 0 : i32
    %c0_i32_1 = arith.constant 0 : i32
    %c0_i32_2 = arith.constant 0 : i32
    return %arg0, %c0_i32, %c0_i32_0, %c0_i32_1 : i32, i32, i32, i32
  }
  func.func @transform_2(%arg0: i32) -> (i32, i32) {
    %c0_i32 = arith.constant 0 : i32
    %c0_i32_0 = arith.constant 0 : i32
    %c0_i32_1 = arith.constant 0 : i32
    return %c0_i32, %c0_i32_0 : i32, i32
  }
  func.func @transform_3(%arg0: i32) -> (i32, i32, i32) {
    %c0_i32 = arith.constant 0 : i32
    %c0_i32_0 = arith.constant 0 : i32
    %c0_i32_1 = arith.constant 0 : i32
    return %arg0, %c0_i32, %c0_i32_0 : i32, i32, i32
  }
  func.func @transform_4(%arg0: i32) -> (i32, i32, i32) {
    %c0_i32 = arith.constant 0 : i32
    %c0_i32_0 = arith.constant 0 : i32
    %c0_i32_1 = arith.constant 0 : i32
    return %arg0, %c0_i32, %c0_i32_0 : i32, i32, i32
  }
}

</mosaic_0001>

<bundles_post_ra>
// kernel: combined_loss.1
= control target key start
LH: loop header
LB: loop body
LE: loop exit
PB: predicated region body
PF: predicated region fallthrough
CT: control target
= control target key end

     0   :  { %s4709_s0 = inlined_call_operand.hbm [shape: f32[2,3,16,16], index: 0, kind: input, shape index: {}]   ;;  %s4710_s1 = inlined_call_operand.hbm [shape: f32[2,3,16,16], index: 1, kind: input, shape index: {}]   ;;  %s4711_s2 = inlined_call_operand.hbm [shape: f32[16,6], index: 2, kind: input, shape index: {}]   ;;  %s4712_s3 = inlined_call_operand.hbm [shape: f32[2,16,16], index: 3, kind: output, shape index: {0}]   ;;  %s4713_s4 = inlined_call_operand.hbm [shape: f32[2,1,128], index: 4, kind: output, shape index: {1}]  }
   0x1   :  { %4736 = sst [smem:[#allocation36_spill]] %s4709_s0 }
   0x2   :  { %10 = vsyncpa [#allocation3], 0 }
   0x3   :  { %12 = vsyncpa [#allocation3 + $0x1], 0 }
   0x4   :  { %13 = vsyncpa [#allocation6], 0 }
   0x5   :  { %15 = vsyncpa [#allocation6 + $0x1], 0 }
   0x6   :  { %16 = vsyncpa [#allocation4], 0 }
   0x7   :  { %18 = vsyncpa [#allocation4 + $0x1], 0 }
   0x8   :  { %19 = vsyncpa [#allocation10], 0 }
   0x9   :  { %21 = vsyncpa [#allocation10 + $0x1], 0  ;;  %s3285_s15 = smov 0   ;;  %s3287_s16 = smov 0  }
   0xa   :  { %s3289_s17 = smov 0   ;;  %s3291_s18 = smov 0  }
   0xb LB: > { %s3306_s19 = sadd.s32 4294967295, %s3229_s18   ;;  %s2557_s20 = sadd.s32 4294967294, %s3229_s18   ;;  %s3229_s18 = sphi %s3291_s18, %s4834_s18   ;;  %s3225_s17 = sphi %s3289_s17, %s4833_s17   ;;  %s3221_s16 = sphi %s3287_s16, %s4832_s16   ;;  %s3217_s15 = sphi %s3285_s15, %s4831_s15  }
   0xc   : > { %p47_p0 = scmp.ne.s32.totalorder %s3221_s16, %s3217_s15  ;;  %p4714_p1 = scmp.eq.s32.totalorder %s3306_s19, 0 }
   0xd   : > { %p124_p3 = scmp.eq.s32.totalorder %s2557_s20, 1  ;;  %p2558_p5 = scmp.ge.s32.totalorder %s3229_s18, 1 }
   0xe   : > { %p3315_p4 = por %p4714_p1, %p47_p0  ;;  %p157_p7 = scmp.lt.s32.totalorder %s3229_s18, 3 }
   0xf   : > { %p3320_p6 = por %p124_p3, %p47_p0  ;;  %s3243_s24 = smov [#allocation7]  }
  0x10   : > { %s4737_s21 = scalar_select %p3315_p4, 1, 0 }
  0x11   : > { %s4738_s22 = scalar_select %p3320_p6, 1, 0 }
  0x12   : > { %p3325_p8 = pnand %p2558_p5, %p157_p7  ;;  %s169_s25 = sshll.u32 %s3243_s24, 4  ;;  %s3329_s25 = int_to_ptr.vmem [resolvable:$true] %s169_s25 }
  0x13   : > { %s3341_s27 = sadd.s32 1, %s3229_s18   ;;  %s34_s28 = sadd.s32 1, %s3225_s17 }
  0x14   : > { %s4739_s23 = scalar_select %p3325_p8, 1, 0 }
  0x15   : > { %p2786_p9 = pneg %p3325_p8  ;;  %s31_s29 = ssub.s32 %s3229_s18, %s3341_s27 }
  0x16   : > { %s3023_s6 = scalar_lea.hbm %s4711_s2, 256 }
  0x17   : > { %p3336_p11 = pnand %p2786_p9, %p4714_p1  ;;  %p3024_p12 = scmp.ne.s32.totalorder %s4711_s2, %s3023_s6 }
  0x18   : > { %p3030_p5 = scmp.lt.u32.totalorder %s3023_s6, %s4711_s2 }
  0x19   : > { %p3025_p13 = pneg %p3336_p11 }
  0x1b   : > { %p3026_p0 = pnand %p3025_p13, %p3024_p12 }
  0x1d   : > { %p3027_p3 = pneg %p3026_p0 }
  0x1f   : > { %p3032_p7 = pnand %p3030_p5, %p3027_p3 }
  0x21   : > { %3035 = shalt.err (!%p3032_p7)
}
  0x22   : > { %s3036_s11 = scalar_lea.vmem %s3329_s25, 256  ;;  %p3044_p2 = scmp.lt.s32.totalorder %s3329_s25, %s3329_s25 }
  0x23   : > { %p3037_p9 = scmp.ne.s32.totalorder %s3329_s25, %s3036_s11  ;;  %p3045_p6 = scmp.lt.s32.totalorder %s3036_s11, %s3036_s11 }
  0x25   : > { %p3039_p10 = pnand %p3037_p9, %p3025_p13  ;;  %p3046_p4 = por %p3045_p6, %p3044_p2 }
  0x27   : > { %p3040_p1 = pneg %p3039_p10 }
  0x29   : > { %p3047_p8 = pnand %p3046_p4, %p3040_p1 }
  0x2b   : > { %3050 = shalt.err (!%p3047_p8)
}
  0x2c   : > { %s3244_s12 = smov 128   ;;  %s3245_s13 = smov 8  }
  0x2d   : > { %2789 = dma.hbm_to_vmem [thread:$0]  (!%p3336_p11), %s4711_s2, 256, %s3329_s25, [#allocation6], %s3244_s12, %s3244_s12, %s3245_s13  }
  0x2e   : > { %p32_p1 = scmp.eq.s32.totalorder %s31_s29, 0  ;;  %p41_p2 = scmp.ne.s32.totalorder %s3225_s17, %s3221_s16 }
  0x2f   : > { %p42_p4 = scmp.eq.s32.totalorder %s3229_s18, 0  ;;  %p2805_p6 = scmp.lt.s32.totalorder %s3229_s18, 2 }
  0x30   : > { %s3375_s24 = scalar_select %p32_p1, %s3225_s17, %s34_s28  }
  0x31   : > { %p43_p8 = por %p42_p4, %p41_p2  ;;  %p4741_p10 = scmp.eq.s32.totalorder %s3306_s19, 1 }
  0x32   : > { %s183_s26 = sand.u32 1, %s3225_s17   ;;  %s4717_s5 = smul.u32 768, %s3229_s18 }
  0x33   : > { %p3379_p12 = por %p4741_p10, %p41_p2  ;;  %s3385_s6 = smul.u32 48, %s183_s26 }
  0x34   : > { %s4743_s0 = sld [smem:[#allocation36_spill]]  ;;  %p3394_p11 = pnand %p2805_p6, %p43_p8 }
  0x35   : > { %s187_s9 = scalar_lea.vmem [#allocation2], %s3385_s6  ;;  %s3402_s11 = scalar_lea.sflag [#allocation3], %s183_s26 }
  0x36   : > { %s194_s10 = sshll.u32 %s187_s9, 4  ;;  %p3053_p0 = pneg %p3394_p11  ;;  %s3400_s10 = int_to_ptr.vmem [resolvable:$true] %s194_s10 }
  0x3a   : > { %s3392_s25 = scalar_lea.hbm %s4743_s0, %s4717_s5  ;;  %s3056_s8 = scalar_lea.hbm %s4743_s0, 1536 }
  0x3b   : > { %s3051_s14 = scalar_lea.hbm %s3392_s25, 768  ;;  %p3057_p7 = scmp.lt.u32.totalorder %s3392_s25, %s4743_s0 }
  0x3c   : > { %p3052_p13 = scmp.ne.s32.totalorder %s3392_s25, %s3051_s14  ;;  %p3058_p9 = scmp.lt.u32.totalorder %s3056_s8, %s3051_s14 }
  0x3d   : > { %p3060_p2 = scmp.lt.u32.totalorder %s3051_s14, %s3392_s25 }
  0x3e   : > { %p3054_p3 = pnand %p3053_p0, %p3052_p13  ;;  %p3059_p1 = por %p3058_p9, %p3057_p7 }
  0x40   : > { %p3055_p5 = pneg %p3054_p3  ;;  %p3061_p4 = por %p3060_p2, %p3059_p1 }
  0x42   : > { %p3062_p6 = pnand %p3061_p4, %p3055_p5 }
  0x44   : > { %3065 = shalt.err (!%p3062_p6)
}
  0x45   : > { %s3066_s26 = scalar_lea.vmem %s3400_s10, 768  ;;  %s3246_s9 = smov [#allocation2]  }
  0x46   : > { %p3067_p8 = scmp.ne.s32.totalorder %s3400_s10, %s3066_s26  ;;  %s3071_s20 = sshll.u32 %s3246_s9, 4  ;;  %s3072_s20 = int_to_ptr.vmem [resolvable:$false] %s3071_s20 }
  0x47   : > { %s3073_s5 = scalar_lea.vmem %s3072_s20, 1536  ;;  %p3074_p3 = scmp.lt.s32.totalorder %s3400_s10, %s3072_s20 }
  0x48   : > { %p3069_p10 = pnand %p3067_p8, %p3053_p0  ;;  %p3075_p7 = scmp.lt.s32.totalorder %s3073_s5, %s3066_s26 }
  0x4a   : > { %p3070_p13 = pneg %p3069_p10  ;;  %p3076_p9 = por %p3075_p7, %p3074_p3 }
  0x4c   : > { %p3077_p1 = pnand %p3076_p9, %p3070_p13 }
  0x4e   : > { %3080 = shalt.err (!%p3077_p1)
}
  0x4f   : > { %2793 = dma.hbm_to_vmem [thread:$0]  (!%p3394_p11), %s3392_s25, 768, %s3400_s10, %s3402_s11, %s3244_s12, %s3244_s12, %s3245_s13  }
  0x50   : > { %s4745_s29 = smul.u32 768, %s3229_s18  ;;  %s208_s26 = scalar_lea.vmem [#allocation5], %s3385_s6 }
  0x51   : > { %s215_s9 = sshll.u32 %s208_s26, 4  ;;  %s4746_s20 = sand.u32 1, %s3229_s18   ;;  %s3441_s9 = int_to_ptr.vmem [resolvable:$true] %s215_s9 }
  0x52   : > { %s3438_s8 = scalar_lea.hbm %s4710_s1, %s4745_s29  ;;  %s3445_s5 = scalar_lea.sflag [#allocation6], %s4746_s20 }
  0x53   : > { %s3081_s0 = scalar_lea.hbm %s3438_s8, 768  ;;  %s3086_s11 = scalar_lea.hbm %s4710_s1, 1536 }
  0x54   : > { %p3082_p5 = scmp.ne.s32.totalorder %s3438_s8, %s3081_s0  ;;  %p3087_p6 = scmp.lt.u32.totalorder %s3438_s8, %s4710_s1 }
  0x55   : > { %p3088_p8 = scmp.lt.u32.totalorder %s3086_s11, %s3081_s0  ;;  %p3090_p13 = scmp.lt.u32.totalorder %s3081_s0, %s3438_s8 }
  0x56   : > { %p3084_p2 = pnand %p3082_p5, %p3053_p0 }
  0x57   : > { %p3089_p10 = por %p3088_p8, %p3087_p6 }
  0x58   : > { %p3085_p4 = pneg %p3084_p2 }
  0x59   : > { %p3091_p3 = por %p3090_p13, %p3089_p10 }
  0x5b   : > { %p3092_p7 = pnand %p3091_p3, %p3085_p4 }
  0x5d   : > { %3095 = shalt.err (!%p3092_p7)
}
  0x5e   : > { %s3096_s6 = scalar_lea.vmem %s3441_s9, 768  ;;  %s3247_s7 = smov [#allocation5]  }
  0x5f   : > { %p3097_p9 = scmp.ne.s32.totalorder %s3441_s9, %s3096_s6  ;;  %s3101_s26 = sshll.u32 %s3247_s7, 4  ;;  %s3102_s26 = int_to_ptr.vmem [resolvable:$false] %s3101_s26 }
  0x60   : > { %s3103_s20 = scalar_lea.vmem %s3102_s26, 1536  ;;  %p3104_p2 = scmp.lt.s32.totalorder %s3441_s9, %s3102_s26 }
  0x61   : > { %p3099_p1 = pnand %p3097_p9, %p3053_p0  ;;  %p3105_p6 = scmp.lt.s32.totalorder %s3103_s20, %s3096_s6 }
  0x63   : > { %p3100_p5 = pneg %p3099_p1  ;;  %p3106_p8 = por %p3105_p6, %p3104_p2 }
  0x65   : > { %p3107_p10 = pnand %p3106_p8, %p3100_p5 }
  0x67   : > { %3110 = shalt.err (!%p3107_p10)
}
  0x68   : > { %2796 = dma.hbm_to_vmem [thread:$0]  (!%p3394_p11), %s3438_s8, 768, %s3441_s9, %s3445_s5, %s3244_s12, %s3244_s12, %s3245_s13  }
  0x69   : > { %p4747_p0 = scmp.ne.s32.totalorder %s4739_s23, 0 }
  0x6b   : > { %227 = sbr.rel (%p4747_p0) target bundleno = 1201 (0x4b1), region = 32 }
  0x72   : > { %s3477_s0 = sand.u32 1, %s3221_s16   ;;  %p4748_p4 = scmp.ne.s32.totalorder %s4737_s21, 0 }
  0x73   : > { %s2765_s25 = smul.u32 48, %s3477_s0  ;;  %s230_s10 = scalar_lea.sflag [#allocation3], %s3477_s0 }
  0x75   : > { %s3481_s11 = scalar_lea.vmem [#allocation2], %s2765_s25 }
  0x76   : > { %3196 = dma.done.wait (%p4748_p4), %s230_s10, 768  }
  0x77   : > { %3198 = vsyncadd (%p4748_p4), %s230_s10, 4294966528  ;;  %s238_s12 = sand.u32 1, %s3306_s19   ;;  %s3488_s13 = scalar_lea.vmem [#allocation5], %s2765_s25 }
  0x78   : > { %s239_s23 = scalar_lea.sflag [#allocation6], %s238_s12 }
  0x79   : > { %3200 = dma.done.wait (%p4748_p4), %s239_s23, 768  }
  0x7a   : > { %3202 = vsyncadd (%p4748_p4), %s239_s23, 4294966528  ;;  %p4749_p11 = scmp.eq.s32.totalorder %s3306_s19, 0 }
  0x7c   : > { %3204 = dma.done.wait (%p4749_p11), [#allocation6], 256   ;;  %p4750_p13 = pmov %p4749_p11 }
  0x7d   : > { %vm304_vm0 = vcmask 130048   ;;  %v343_v0 = vld [vmem:[#allocation7] sm:$0xff]  ;;  %v344_v1 = vld [vmem:[#allocation7 + $0x8] sm:$0xff]  ;;  %vm875_vm1 = vcmask 1044480   ;;  %vm1011_vm2 = vcmask 1043456   ;;  %vm1147_vm3 = vcmask 1042432  }
  0x7e   : > { %3206 = vsyncadd (%p4750_p13), [#allocation6], 4294967040  ;;  %v3499_v2 = vld [vmem:[%s3481_s11] sm:$0xff]  ;;  %v2749_v3 = vpack.c.bf16 %v344_v1, %v343_v0  ;;  %v281_v8 = vld [vmem:[%s3481_s11 + $0x8] sm:$0xff]  ;;  %vm1223_vm4 = vcmask 1041408   ;;  %vm1299_vm5 = vcmask 1040384  }
  0x7f   : > { %v3502_v4 = vld [vmem:[%s3488_s13] sm:$0xff]  ;;  %2704 = vmatprep.mubr.msk.f32.mxu0 %vm304_vm0, %v3499_v2  ;;  %v287_v9 = vld [vmem:[%s3488_s13 + $0x8] sm:$0xff]  ;;  %v282_v13 = vld [vmem:[%s3481_s11 + $0x10] sm:$0xff]  ;;  %v325_v30 = vmul.f32 %v3499_v2, %v3499_v2  ;;  %v326_v32 = vmul.f32 %v281_v8, %v281_v8  ;;  %vm1612_vm6 = vcmask 46080   ;;  %s2565_s21 = sshll.u32 %s3477_s0, 4  ;;  %s279_s5 = scalar_lea.vmem [#allocation9], %s3477_s0 }
  0x80   : > { %v3507_v5 = vld [vmem:[%s3481_s11 + $0x20] sm:$0xff]  ;;  %v292_v6 = vsub.f32 %v3499_v2, %v3502_v4  ;;  %v3516_v10 = vld [vmem:[%s3481_s11 + $0x28] sm:$0xff]  ;;  %2750 = vmatprep.subr.bf16.mxu0 %v2749_v3  ;;  %2757 = vmatprep.subr.bf16.mxu1 %v2749_v3  ;;  %v293_v11 = vsub.f32 %v281_v8, %v287_v9  ;;  %v288_v14 = vld [vmem:[%s3488_s13 + $0x10] sm:$0xff]  ;;  %v331_v16 = vmul.f32 %v3502_v4, %v3502_v4  ;;  %s4249_s9 = scalar_lea.vmem [#allocation8], %s2565_s21  ;;  %s4256_s29 = smov 0  }
  0x81   : > { %v329_v7 = vmul.f32 %v3507_v5, %v3507_v5  ;;  %v330_v12 = vmul.f32 %v3516_v10, %v3516_v10  ;;  %2752 = vmatpush3.bf16.msra.mxu0 %v2749_v3  ;;  %2758 = vmatpush3.bf16.msra.mxu1 %v2749_v3  ;;  %v294_v15 = vsub.f32 %v282_v13, %v288_v14  ;;  %v3530_v18 = vld [vmem:[%s3481_s11 + $0x18] sm:$0xff]  ;;  %v3536_v21 = vld [vmem:[%s3488_s13 + $0x20] sm:$0xff]  ;;  %v3549_v24 = vld [vmem:[%s3488_s13 + $0x28] sm:$0xff] }
  0x82   : > { %v332_v17 = vmul.f32 %v287_v9, %v287_v9  ;;  %v333_v19 = vmul.f32 %v288_v14, %v288_v14  ;;  %v3533_v20 = vld [vmem:[%s3488_s13 + $0x18] sm:$0xff]  ;;  %v335_v23 = vmul.f32 %v3536_v21, %v3536_v21  ;;  %v336_v25 = vmul.f32 %v3549_v24, %v3549_v24 }
  0x83   : > { %2728 = vmatprep.mubr.msk.f32.mxu1 %vm304_vm0, %v329_v7  ;;  %v334_v22 = vmul.f32 %v3533_v20, %v3533_v20  ;;  %v337_v26 = vmul.f32 %v3502_v4, %v3499_v2  ;;  %v338_v27 = vmul.f32 %v287_v9, %v281_v8  ;;  %v339_v28 = vmul.f32 %v288_v14, %v282_v13 }
  0x84   : > { %2705 = vmatmul.mubr.msk.f32.vlgmr.msra.gmra.mrb[0].mxu0 %vm304_vm0, %v281_v8  ;;  %2729 = vmatmul.mubr.msk.f32.vlgmr.msra.gmra.mrb[0].mxu1 %vm304_vm0, %v330_v12  ;;  %v340_v29 = vmul.f32 %v3533_v20, %v3530_v18  ;;  %v341_v31 = vmul.f32 %v3536_v21, %v3507_v5  ;;  %v342_v33 = vmul.f32 %v3549_v24, %v3516_v10  ;;  %v3593_v36 = vand.u32 2147483647, %v292_v6 }
  0x85   : > { %2707 = vmatprep.mubr.msk.f32.mxu0 %vm304_vm0, %v282_v13  ;;  %2731 = vmatprep.mubr.msk.f32.mxu1 %vm304_vm0, %v331_v16  ;;  %v327_v34 = vmul.f32 %v282_v13, %v282_v13  ;;  %v328_v35 = vmul.f32 %v3530_v18, %v3530_v18  ;;  %v3595_v37 = vand.u32 2147483647, %v293_v11  ;;  %v3597_v38 = vand.u32 2147483647, %v294_v15 }
  0x88   : > { %2708 = vmatmul.mubr.msk.f32.gmra.mrb[2].mxu0 %vm304_vm0, %v3530_v18  ;;  %2732 = vmatmul.mubr.msk.f32.gmra.mrb[2].mxu1 %vm304_vm0, %v332_v17 }
  0x89   : > { %2710 = vmatprep.mubr.msk.f32.mxu0 %vm304_vm0, %v3507_v5  ;;  %2734 = vmatprep.mubr.msk.f32.mxu1 %vm304_vm0, %v333_v19 }
  0x8c   : > { %2711 = vmatmul.mubr.msk.f32.gmra.mrb[4].mxu0 %vm304_vm0, %v3516_v10  ;;  %2735 = vmatmul.mubr.msk.f32.gmra.mrb[4].mxu1 %vm304_vm0, %v334_v22 }
  0x8d   : > { %2713 = vmatprep.mubr.msk.f32.mxu0 %vm304_vm0, %v3502_v4  ;;  %2737 = vmatprep.mubr.msk.f32.mxu1 %vm304_vm0, %v335_v23 }
  0x90   : > { %2714 = vmatmul.mubr.msk.f32.gmra.mrb[6].mxu0 %vm304_vm0, %v287_v9  ;;  %2738 = vmatmul.mubr.msk.f32.gmra.mrb[6].mxu1 %vm304_vm0, %v336_v25 }
  0x91   : > { %2716 = vmatprep.mubr.msk.f32.mxu0 %vm304_vm0, %v288_v14  ;;  %2740 = vmatprep.mubr.msk.f32.mxu1 %vm304_vm0, %v337_v26 }
  0x94   : > { %2717 = vmatmul.mubr.msk.f32.gmra.mrb[8].mxu0 %vm304_vm0, %v3533_v20  ;;  %2741 = vmatmul.mubr.msk.f32.gmra.mrb[8].mxu1 %vm304_vm0, %v338_v27 }
  0x95   : > { %2719 = vmatprep.mubr.msk.f32.mxu0 %vm304_vm0, %v3536_v21  ;;  %2743 = vmatprep.mubr.msk.f32.mxu1 %vm304_vm0, %v339_v28 }
  0x98   : > { %2720 = vmatmul.mubr.msk.f32.gmra.mrb[10].mxu0 %vm304_vm0, %v3549_v24  ;;  %2744 = vmatmul.mubr.msk.f32.gmra.mrb[10].mxu1 %vm304_vm0, %v340_v29 }
  0x99   : > { %2722 = vmatprep.mubr.msk.f32.mxu0 %vm304_vm0, %v325_v30  ;;  %2746 = vmatprep.mubr.msk.f32.mxu1 %vm304_vm0, %v341_v31 }
  0x9c   : > { %2723 = vmatmul.mubr.msk.f32.gmra.mrb[12].mxu0 %vm304_vm0, %v326_v32  ;;  %2747 = vmatmul.mubr.msk.f32.gmra.mrb[12].mxu1 %vm304_vm0, %v342_v33 }
  0x9d   : > { %2725 = vmatprep.mubr.msk.f32.mxu0 %vm304_vm0, %v327_v34 }
  0xa0   : > { %2726 = vmatmul.mubr.msk.f32.gmra.mrb[14].mxu0 %vm304_vm0, %v328_v35 }
 0x157   : > { %v2706_v39 = vpop.f32.mrb[0].mxu0  ;;  %v2730_v40 = vpop.f32.mrb[0].mxu1 }
 0x158   : > { %v3599_v41 = vmul.f32 0.10936069, %v2706_v39  ;;  %v952_v42 = vmul.f32 0.21300554, %v2706_v39  ;;  %v1088_v43 = vmul.f32 0.26601171, %v2706_v39 }
 0x159   : > { %v3601_v44 = vmul.f32 0.036000773, %v2706_v39  ;;  %v3603_v45 = vmul.f32 0.007598758, %v2706_v39  ;;  %v3605_v46 = vmul.f32 0.0010283801, %v2706_v39 }
 0x15a   : > { %v877_v47 = vrot.slane %v3599_v41, 3  ;;  %v1013_v48 = vrot.slane %v952_v42, 4  ;;  %v1149_v49 = vrot.slane %v1088_v43, 5  ;;  %v501_v50 = vpop.f32.mrb[1].mxu0  ;;  %v581_v51 = vpop.f32.mrb[1].mxu1  ;;  %v1225_v52 = vrot.slane %v952_v42, 6 }
 0x15b   : > { %4751 = vst [vmem:[#allocation16_spill] sm:$0xff] %v3605_v46  ;;  %v1301_v53 = vrot.slane %v3599_v41, 7  ;;  %v3610_v55 = vmul.f32 0.10936069, %v2730_v40  ;;  %v3612_v56 = vpop.f32.mrb[2].mxu0  ;;  %v3629_v4 = vpop.f32.mrb[2].mxu1 }
 0x15c   : > { %v3614_v57 = vmul.f32 0.21300554, %v2730_v40  ;;  %v3616_v58 = vmul.f32 0.26601171, %v2730_v40  ;;  %v3618_v59 = vmul.f32 0.036000773, %v2730_v40 }
 0x15d   : > { %v901_v61 = vrot.slane %v3610_v55, 3  ;;  %v3622_v62 = vmul.f32 0.007598758, %v2730_v40  ;;  %v3624_v63 = vmul.f32 0.0010283801, %v2730_v40  ;;  %v1325_v2 = vrot.slane %v3610_v55, 7 }
 0x15e   : > { %v1037_v0 = vrot.slane %v3614_v57, 4  ;;  %v1173_v1 = vrot.slane %v3616_v58, 5  ;;  %v650_v3 = vmul.f32 0.0010283801, %v501_v50  ;;  %v1249_v6 = vrot.slane %v3614_v57, 6  ;;  %v3633_v26 = vpop.f32.mrb[3].mxu0 }
 0x15f   : > { %4752 = vst [vmem:[#allocation17_spill] sm:$0xff] %v3624_v63  ;;  %v665_v8 = vmul.f32 0.007598758, %v501_v50  ;;  %v740_v9 = vmul.f32 0.036000773, %v501_v50  ;;  %v3635_v27 = vpop.f32.mrb[3].mxu1 }
 0x160   : > { %v815_v11 = vmul.f32 0.10936069, %v501_v50  ;;  %v951_v12 = vmul.f32 0.21300554, %v501_v50  ;;  %v1087_v13 = vmul.f32 0.26601171, %v501_v50 }
 0x161   : > { %v695_v14 = vrot.slane %v665_v8, 1  ;;  %v770_v15 = vrot.slane %v740_v9, 2  ;;  %v658_v16 = vmul.f32 0.0010283801, %v581_v51  ;;  %v673_v17 = vmul.f32 0.007598758, %v581_v51 }
 0x162   : > { %v876_v19 = vrot.slane %v815_v11, 3  ;;  %v1012_v22 = vrot.slane %v951_v12, 4  ;;  %v1148_v23 = vrot.slane %v1087_v13, 5  ;;  %v1224_v25 = vrot.slane %v951_v12, 6  ;;  %v3637_v32 = vpop.f32.mrb[4].mxu0  ;;  %v3639_v33 = vpop.f32.mrb[4].mxu1 }
 0x163   : > { %v725_v28 = vadd.f32 %v695_v14, %v650_v3  ;;  %v1300_v29 = vrot.slane %v815_v11, 7  ;;  %v703_v30 = vrot.slane %v673_v17, 1  ;;  %v748_v31 = vmul.f32 0.036000773, %v581_v51  ;;  %v3645_v41 = vpop.f32.mrb[5].mxu0  ;;  %v3647_v42 = vpop.f32.mrb[5].mxu1 }
 0x164   : > { %v878_v34 = vsel %vm875_vm1, %v876_v19, %v877_v47  ;;  %v1014_v35 = vsel %vm1011_vm2, %v1012_v22, %v1013_v48  ;;  %v1150_v39 = vsel %vm1147_vm3, %v1148_v23, %v1149_v49  ;;  %v1226_v40 = vsel %vm1223_vm4, %v1224_v25, %v1225_v52  ;;  %v3650_v9 = vpop.f32.mrb[6].mxu0  ;;  %v3652_v11 = vpop.f32.mrb[6].mxu1 }
 0x165   : > { %v800_v43 = vadd.f32 %v770_v15, %v725_v28  ;;  %v1302_v50 = vsel %vm1299_vm5, %v1300_v29, %v1301_v53  ;;  %v733_v3 = vadd.f32 %v703_v30, %v658_v16  ;;  %v778_v8 = vrot.slane %v748_v31, 2  ;;  %v3660_v15 = vpop.f32.mrb[7].mxu0  ;;  %v3662_v53 = vpop.f32.mrb[7].mxu1 }
 0x166   : > { %v831_v47 = vmul.f32 0.10936069, %v581_v51  ;;  %v967_v12 = vmul.f32 0.21300554, %v581_v51  ;;  %v1103_v48 = vmul.f32 0.26601171, %v581_v51 }
 0x167   : > { %v936_v13 = vadd.f32 %v878_v34, %v800_v43  ;;  %v808_v49 = vadd.f32 %v778_v8, %v733_v3  ;;  %v3655_v52 = vmul.f32 0.10936069, %v3612_v56  ;;  %v3658_v14 = vmul.f32 0.21300554, %v3612_v56  ;;  %v3664_v23 = vpop.f32.mrb[8].mxu0  ;;  %v3666_v25 = vpop.f32.mrb[8].mxu1 }
 0x168   : > { %v900_v16 = vrot.slane %v831_v47, 3  ;;  %v1036_v17 = vrot.slane %v967_v12, 4  ;;  %v1172_v19 = vrot.slane %v1103_v48, 5  ;;  %v1248_v22 = vrot.slane %v967_v12, 6  ;;  %v3670_v31 = vpop.f32.mrb[9].mxu0  ;;  %v3672_v34 = vpop.f32.mrb[9].mxu1 }
 0x169   : > { %v1072_v28 = vadd.f32 %v1014_v35, %v936_v13  ;;  %v1324_v29 = vrot.slane %v831_v47, 7  ;;  %v1090_v13 = vmul.f32 0.26601171, %v3612_v56  ;;  %v1016_v57 = vrot.slane %v3658_v14, 4 }
 0x16a   : > { %v902_v43 = vsel %vm875_vm1, %v900_v16, %v901_v61  ;;  %v1038_v3 = vsel %vm1011_vm2, %v1036_v17, %v1037_v0  ;;  %v1174_v8 = vsel %vm1147_vm3, %v1172_v19, %v1173_v1  ;;  %v1250_v35 = vsel %vm1223_vm4, %v1248_v22, %v1249_v6 }
 0x16b   : > { %v1208_v47 = vadd.f32 %v1150_v39, %v1072_v28  ;;  %v944_v12 = vadd.f32 %v902_v43, %v808_v49  ;;  %v1326_v48 = vsel %vm1299_vm5, %v1324_v29, %v1325_v2  ;;  %v3688_v51 = vpop.f32.mrb[10].mxu0  ;;  %v3690_v61 = vpop.f32.mrb[10].mxu1  ;;  %v1228_v58 = vrot.slane %v3658_v14, 6 }
 0x16c   : > { %v1304_v0 = vrot.slane %v3655_v52, 7  ;;  %v3696_v1 = vmul.f32 0.007598758, %v3612_v56  ;;  %v3699_v55 = vmul.f32 0.036000773, %v3612_v56  ;;  %v3704_v49 = vpop.f32.mrb[11].mxu0 }
 0x16d   : > { %v1284_v6 = vadd.f32 %v1226_v40, %v1208_v47  ;;  %v1080_v39 = vadd.f32 %v1038_v3, %v944_v12  ;;  %v3702_v2 = vmul.f32 0.0010283801, %v3612_v56  ;;  %v3706_v16 = vpop.f32.mrb[11].mxu1  ;;  %v1152_v17 = vrot.slane %v1090_v13, 5 }
 0x16e   : > { %4753 = vst [vmem:[#allocation18_spill] sm:$0xff] %v3696_v1  ;;  %v3710_v19 = vmul.f32 0.10936069, %v3629_v4  ;;  %v3713_v22 = vmul.f32 0.21300554, %v3629_v4 }
 0x16f   : > { %4754 = vst [vmem:[#allocation19_spill] sm:$0xff] %v3702_v2  ;;  %v1360_v40 = vadd.f32 %v1302_v50, %v1284_v6  ;;  %v1216_v28 = vadd.f32 %v1174_v8, %v1080_v39  ;;  %v3717_v56 = vmul.f32 0.26601171, %v3629_v4  ;;  %v3719_v43 = vpop.f32.mrb[12].mxu0  ;;  %v3721_v3 = vpop.f32.mrb[12].mxu1 }
 0x170   : > { %4755 = vst [vmem:[#allocation20_spill] sm:$0xff] %v3719_v43  ;;  %4756 = vst [vmem:[#allocation21_spill] sm:$0xff] %v3721_v3  ;;  %v904_v47 = vrot.slane %v3710_v19, 3  ;;  %v1040_v12 = vrot.slane %v3713_v22, 4  ;;  %v1252_v13 = vrot.slane %v3713_v22, 6  ;;  %v1328_v60 = vrot.slane %v3710_v19, 7 }
 0x171   : > { %v3727_v14 = vpop.f32.mrb[13].mxu0  ;;  %v3729_v50 = vpop.f32.mrb[13].mxu1  ;;  %v1390_v8 = vadd.f32 %v3601_v44, %v1360_v40  ;;  %v1292_v6 = vadd.f32 %v1250_v35, %v1216_v28  ;;  %v1176_v39 = vrot.slane %v3717_v56, 5  ;;  %v3734_v29 = vmul.f32 0.036000773, %v3629_v4 }
 0x172   : > { %4757 = vst [vmem:[#allocation22_spill] sm:$0xff] %v3727_v14  ;;  %4758 = vst [vmem:[#allocation23_spill] sm:$0xff] %v3729_v50  ;;  %v3737_v54 = vmul.f32 0.007598758, %v3629_v4  ;;  %v3740_v30 = vmul.f32 0.0010283801, %v3629_v4 }
 0x173   : > { %v651_v19 = vmul.f32 0.0010283801, %v3633_v26  ;;  %v1368_v22 = vadd.f32 %v1326_v48, %v1292_v6  ;;  %v666_v7 = vmul.f32 0.007598758, %v3633_v26  ;;  %v741_v63 = vmul.f32 0.036000773, %v3633_v26 }
 0x174   : > { %4759 = vst [vmem:[#allocation24_spill] sm:$0xff] %v3740_v30  ;;  %v817_v44 = vmul.f32 0.10936069, %v3633_v26  ;;  %v953_v28 = vmul.f32 0.21300554, %v3633_v26  ;;  %v3751_v48 = vpop.f32.mrb[14].mxu0 }
 0x175   : > { %v1089_v56 = vmul.f32 0.26601171, %v3633_v26  ;;  %v1398_v4 = vadd.f32 %v3618_v59, %v1368_v22  ;;  %v696_v2 = vrot.slane %v666_v7, 1  ;;  %v771_v46 = vrot.slane %v741_v63, 2  ;;  %v3753_v43 = vpop.f32.mrb[15].mxu0 }
 0x176   : > { %v879_v1 = vrot.slane %v817_v44, 3  ;;  %v1015_v6 = vrot.slane %v953_v28, 4  ;;  %v1227_v14 = vrot.slane %v953_v28, 6  ;;  %v1303_v3 = vrot.slane %v817_v44, 7  ;;  %4760 = vst [vmem:[#allocation25_spill] sm:$0xff] %v3753_v43 }
 0x177   : > { %v1151_v50 = vrot.slane %v1089_v56, 5  ;;  %v4761_v35 = vrot.slane %v3622_v62, 1  ;;  %v726_v30 = vadd.f32 %v696_v2, %v651_v19  ;;  %v4763_v26 = vrot.slane %v3655_v52, 3 }
 0x178   : > { %v659_v63 = vmul.f32 0.0010283801, %v3635_v27  ;;  %v1017_v7 = vsel %vm1011_vm2, %v1015_v6, %v1016_v57  ;;  %v1229_v28 = vsel %vm1223_vm4, %v1227_v14, %v1228_v58  ;;  %v1305_v44 = vsel %vm1299_vm5, %v1303_v3, %v1304_v0 }
 0x179   : > { %v3757_v40 = vadd.f32 %v4761_v35, %v1398_v4  ;;  %v881_v59 = vsel %vm875_vm1, %v879_v1, %v4763_v26  ;;  %v1153_v22 = vsel %vm1147_vm3, %v1151_v50, %v1152_v17  ;;  %v801_v56 = vadd.f32 %v771_v46, %v726_v30 }
 0x17a   : > { %v674_v62 = vmul.f32 0.007598758, %v3635_v27  ;;  %v749_v35 = vmul.f32 0.036000773, %v3635_v27  ;;  %v833_v2 = vmul.f32 0.10936069, %v3635_v27 }
 0x17b   : > { %4762 = vst [vmem:[#allocation26_spill] sm:$0xff] %v3757_v40  ;;  %v969_v52 = vmul.f32 0.21300554, %v3635_v27  ;;  %v1105_v1 = vmul.f32 0.26601171, %v3635_v27  ;;  %v4764_v57 = vrot.slane %v3603_v45, 1  ;;  %v937_v58 = vadd.f32 %v881_v59, %v801_v56 }
 0x17c   : > { %v3773_v19 = vmul.f32 0.10936069, %v3637_v32  ;;  %v704_v0 = vrot.slane %v674_v62, 1  ;;  %v779_v46 = vrot.slane %v749_v35, 2  ;;  %v903_v30 = vrot.slane %v833_v2, 3 }
 0x17d   : > { %v3777_v17 = vadd.f32 %v4764_v57, %v1390_v8  ;;  %v1039_v14 = vrot.slane %v969_v52, 4  ;;  %v1175_v3 = vrot.slane %v1105_v1, 5  ;;  %v1251_v50 = vrot.slane %v969_v52, 6 }
 0x17e   : > { %v1327_v4 = vrot.slane %v833_v2, 7  ;;  %v1073_v6 = vadd.f32 %v1017_v7, %v937_v58  ;;  %v734_v26 = vadd.f32 %v704_v0, %v659_v63  ;;  %v905_v40 = vsel %vm875_vm1, %v903_v30, %v904_v47 }
 0x17f   : > { %v883_v27 = vrot.slane %v3773_v19, 3  ;;  %v1041_v43 = vsel %vm1011_vm2, %v1039_v14, %v1040_v12  ;;  %v1177_v45 = vsel %vm1147_vm3, %v1175_v3, %v1176_v39  ;;  %v1253_v8 = vsel %vm1223_vm4, %v1251_v50, %v1252_v13 }
 0x180   : > { %v1329_v59 = vsel %vm1299_vm5, %v1327_v4, %v1328_v60  ;;  %v1209_v56 = vadd.f32 %v1153_v22, %v1073_v6  ;;  %v809_v62 = vadd.f32 %v779_v46, %v734_v26  ;;  %v956_v35 = vmul.f32 0.21300554, %v3637_v32 }
 0x181   : > { %v1092_v2 = vmul.f32 0.26601171, %v3637_v32  ;;  %v1307_v63 = vrot.slane %v3773_v19, 7  ;;  %v3789_v47 = vmul.f32 0.036000773, %v3637_v32 }
 0x182   : > { %v3792_v7 = vmul.f32 0.007598758, %v3637_v32  ;;  %v1285_v13 = vadd.f32 %v1229_v28, %v1209_v56  ;;  %v945_v39 = vadd.f32 %v905_v40, %v809_v62  ;;  %v1019_v60 = vrot.slane %v956_v35, 4 }
 0x183   : > { %v1155_v22 = vrot.slane %v1092_v2, 5  ;;  %v1231_v52 = vrot.slane %v956_v35, 6  ;;  %v3798_v57 = vmul.f32 0.0010283801, %v3637_v32  ;;  %v3801_v19 = vmul.f32 0.10936069, %v3639_v33 }
 0x184   : > { %v1361_v58 = vadd.f32 %v1305_v44, %v1285_v13  ;;  %v1081_v0 = vadd.f32 %v1041_v43, %v945_v39  ;;  %v972_v46 = vmul.f32 0.21300554, %v3639_v33  ;;  %v3805_v30 = vmul.f32 0.26601171, %v3639_v33 }
 0x185   : > { %v907_v28 = vrot.slane %v3801_v19, 3  ;;  %v1331_v14 = vrot.slane %v3801_v19, 7  ;;  %v3811_v3 = vmul.f32 0.036000773, %v3639_v33  ;;  %v3818_v6 = vmul.f32 0.007598758, %v3639_v33 }
 0x186   : > { %v3814_v32 = vadd.f32 %v3699_v55, %v1361_v58  ;;  %v1217_v50 = vadd.f32 %v1177_v45, %v1081_v0  ;;  %v1043_v44 = vrot.slane %v972_v46, 4  ;;  %v1179_v43 = vrot.slane %v3805_v30, 5 }
 0x187   : > { %v1255_v4 = vrot.slane %v972_v46, 6  ;;  %v3821_v26 = vmul.f32 0.0010283801, %v3639_v33  ;;  %v652_v35 = vmul.f32 0.0010283801, %v3645_v41 }
 0x188   : > { %v1293_v62 = vadd.f32 %v1253_v8, %v1217_v50  ;;  %v667_v55 = vmul.f32 0.007598758, %v3645_v41  ;;  %v742_v45 = vmul.f32 0.036000773, %v3645_v41  ;;  %v819_v39 = vmul.f32 0.10936069, %v3645_v41 }
 0x189   : > { %4765 = vst [vmem:[#allocation27_spill] sm:$0xff] %v3821_v26  ;;  %v955_v19 = vmul.f32 0.21300554, %v3645_v41  ;;  %v1091_v46 = vmul.f32 0.26601171, %v3645_v41  ;;  %v4766_v41 = vrot.slane %v3737_v54, 1 }
 0x18a   : > { %v1369_v33 = vadd.f32 %v1329_v59, %v1293_v62  ;;  %v697_v58 = vrot.slane %v667_v55, 1  ;;  %v772_v0 = vrot.slane %v742_v45, 2  ;;  %v882_v8 = vrot.slane %v819_v39, 3 }
 0x18b   : > { %v1018_v30 = vrot.slane %v955_v19, 4  ;;  %v1230_v50 = vrot.slane %v955_v19, 6  ;;  %v1306_v40 = vrot.slane %v819_v39, 7  ;;  %v1154_v12 = vrot.slane %v1091_v46, 5 }
 0x18c   : > { %v1399_v1 = vadd.f32 %v3734_v29, %v1369_v33  ;;  %v727_v56 = vadd.f32 %v697_v58, %v652_v35  ;;  %v660_v2 = vmul.f32 0.0010283801, %v3647_v42  ;;  %v884_v13 = vsel %vm875_vm1, %v882_v8, %v883_v27 }
 0x18d   : > { %v1020_v26 = vsel %vm1011_vm2, %v1018_v30, %v1019_v60  ;;  %v1232_v59 = vsel %vm1223_vm4, %v1230_v50, %v1231_v52  ;;  %v1308_v62 = vsel %vm1299_vm5, %v1306_v40, %v1307_v63  ;;  %v1156_v39 = vsel %vm1147_vm3, %v1154_v12, %v1155_v22 }
 0x18e   : > { %v3841_v55 = vadd.f32 %v4766_v41, %v1399_v1  ;;  %v802_v45 = vadd.f32 %v772_v0, %v727_v56  ;;  %v675_v29 = vmul.f32 0.007598758, %v3647_v42  ;;  %v750_v35 = vmul.f32 0.036000773, %v3647_v42 }
 0x18f   : > { %v835_v19 = vmul.f32 0.10936069, %v3647_v42  ;;  %v971_v27 = vmul.f32 0.21300554, %v3647_v42  ;;  %v1107_v54 = vmul.f32 0.26601171, %v3647_v42 }
 0x190   : > { %4767 = vst [vmem:[#allocation28_spill] sm:$0xff] %v3841_v55  ;;  %v938_v52 = vadd.f32 %v884_v13, %v802_v45  ;;  %v705_v63 = vrot.slane %v675_v29, 1  ;;  %v3852_v1 = vmul.f32 0.10936069, %v3650_v9  ;;  %v780_v40 = vrot.slane %v750_v35, 2 }
 0x191   : > { %v906_v12 = vrot.slane %v835_v19, 3  ;;  %v1042_v22 = vrot.slane %v971_v27, 4  ;;  %v1254_v56 = vrot.slane %v971_v27, 6  ;;  %v1178_v0 = vrot.slane %v1107_v54, 5 }
 0x192   : > { %v1074_v33 = vadd.f32 %v1020_v26, %v938_v52  ;;  %v735_v58 = vadd.f32 %v705_v63, %v660_v2  ;;  %v1330_v46 = vrot.slane %v835_v19, 7  ;;  %v886_v50 = vrot.slane %v3852_v1, 3 }
 0x193   : > { %v908_v8 = vsel %vm875_vm1, %v906_v12, %v907_v28  ;;  %v1044_v30 = vsel %vm1011_vm2, %v1042_v22, %v1043_v44  ;;  %v1256_v13 = vsel %vm1223_vm4, %v1254_v56, %v1255_v4  ;;  %v1180_v45 = vsel %vm1147_vm3, %v1178_v0, %v1179_v43 }
 0x194   : > { %v1210_v42 = vadd.f32 %v1156_v39, %v1074_v33  ;;  %v810_v41 = vadd.f32 %v780_v40, %v735_v58  ;;  %v1332_v29 = vsel %vm1299_vm5, %v1330_v46, %v1331_v14  ;;  %v958_v35 = vmul.f32 0.21300554, %v3650_v9 }
 0x195   : > { %v1094_v26 = vmul.f32 0.26601171, %v3650_v9  ;;  %v1310_v2 = vrot.slane %v3852_v1, 7  ;;  %v305_v28 = vsel %vm304_vm0, %v3593_v36, 0.0  ;;  %v3866_v4 = vmul.f32 0.036000773, %v3650_v9 }
 0x196   : > { %v1286_v44 = vadd.f32 %v1232_v59, %v1210_v42  ;;  %v946_v19 = vadd.f32 %v908_v8, %v810_v41  ;;  %v3869_v39 = vmul.f32 0.007598758, %v3650_v9  ;;  %v1022_v43 = vrot.slane %v958_v35, 4 }
 0x197   : > { %v1158_v27 = vrot.slane %v1094_v26, 5  ;;  %v1234_v14 = vrot.slane %v958_v35, 6  ;;  %v3872_v52 = vmul.f32 0.0010283801, %v3650_v9  ;;  %v838_v36 = vmul.f32 0.10936069, %v3652_v11 }
 0x198   : > { %v3874_v63 = vadd.f32 %v1308_v62, %v1286_v44  ;;  %v1082_v54 = vadd.f32 %v1044_v30, %v946_v19  ;;  %v3880_v40 = vmul.f32 0.21300554, %v3652_v11  ;;  %v1110_v12 = vmul.f32 0.26601171, %v3652_v11 }
 0x199   : > { %v306_v22 = vsel %vm304_vm0, %v3595_v37, 0.0  ;;  %v910_v9 = vrot.slane %v838_v36, 3  ;;  %v1334_v33 = vrot.slane %v838_v36, 7  ;;  %v3886_v62 = vmul.f32 0.036000773, %v3652_v11 }
 0x19a   : > { %v1218_v56 = vadd.f32 %v1180_v45, %v1082_v54  ;;  %v1046_v58 = vrot.slane %v3880_v40, 4  ;;  %v1182_v0 = vrot.slane %v1110_v12, 5  ;;  %v1258_v46 = vrot.slane %v3880_v40, 6 }
 0x19b   : > { %v3891_v8 = vmul.f32 0.007598758, %v3652_v11  ;;  %v3894_v42 = vmul.f32 0.0010283801, %v3652_v11  ;;  %v653_v37 = vmul.f32 0.0010283801, %v3660_v15  ;;  %v3901_v44 = vadd.f32 %v306_v22, %v305_v28 }
 0x19c   : > { %v1294_v30 = vadd.f32 %v1256_v13, %v1218_v56  ;;  %v668_v41 = vmul.f32 0.007598758, %v3660_v15  ;;  %v743_v35 = vmul.f32 0.036000773, %v3660_v15  ;;  %v821_v26 = vmul.f32 0.10936069, %v3660_v15 }
 0x19d   : > { %4768 = vst [vmem:[#allocation29_spill] sm:$0xff] %v3894_v42  ;;  %v957_v13 = vmul.f32 0.21300554, %v3660_v15  ;;  %v1093_v12 = vmul.f32 0.26601171, %v3660_v15 }
 0x19e   : > { %v1370_v19 = vadd.f32 %v1332_v29, %v1294_v30  ;;  %v698_v36 = vrot.slane %v668_v41, 1  ;;  %v773_v11 = vrot.slane %v743_v35, 2  ;;  %v885_v40 = vrot.slane %v821_v26, 3 }
 0x19f   : > { %v1309_v56 = vrot.slane %v821_v26, 7  ;;  %v1021_v60 = vrot.slane %v957_v13, 4  ;;  %v1233_v45 = vrot.slane %v957_v13, 6  ;;  %v1157_v28 = vrot.slane %v1093_v12, 5 }
 0x1a0   : > { %v1400_v59 = vadd.f32 %v3811_v3, %v1370_v19  ;;  %v728_v1 = vadd.f32 %v698_v36, %v653_v37  ;;  %v887_v55 = vsel %vm875_vm1, %v885_v40, %v886_v50  ;;  %v661_v22 = vmul.f32 0.0010283801, %v3662_v53 }
 0x1a1   : > { %v1311_v29 = vsel %vm1299_vm5, %v1309_v56, %v1310_v2  ;;  %v4769_v30 = vrot.slane %v3818_v6, 1  ;;  %v1023_v15 = vsel %vm1011_vm2, %v1021_v60, %v1022_v43  ;;  %v1235_v26 = vsel %vm1223_vm4, %v1233_v45, %v1234_v14 }
 0x1a2   : > { %v803_v35 = vadd.f32 %v773_v11, %v728_v1  ;;  %v1159_v3 = vsel %vm1147_vm3, %v1157_v28, %v1158_v27  ;;  %v676_v37 = vmul.f32 0.007598758, %v3662_v53  ;;  %v751_v50 = vmul.f32 0.036000773, %v3662_v53 }
 0x1a3   : > { %v3912_v41 = vadd.f32 %v4769_v30, %v1400_v59  ;;  %v837_v19 = vmul.f32 0.10936069, %v3662_v53  ;;  %v973_v36 = vmul.f32 0.21300554, %v3662_v53  ;;  %v1109_v6 = vmul.f32 0.26601171, %v3662_v53 }
 0x1a4   : > { %v939_v2 = vadd.f32 %v887_v55, %v803_v35  ;;  %v3923_v59 = vmul.f32 0.10936069, %v3664_v23  ;;  %v706_v1 = vrot.slane %v676_v37, 1  ;;  %v781_v60 = vrot.slane %v751_v50, 2 }
 0x1a5   : > { %4770 = vst [vmem:[#allocation30_spill] sm:$0xff] %v3912_v41  ;;  %v909_v43 = vrot.slane %v837_v19, 3  ;;  %v1333_v14 = vrot.slane %v837_v19, 7  ;;  %v1045_v27 = vrot.slane %v973_v36, 4  ;;  %v1181_v13 = vrot.slane %v1109_v6, 5 }
 0x1a6   : > { %v1075_v45 = vadd.f32 %v1023_v15, %v939_v2  ;;  %v1257_v11 = vrot.slane %v973_v36, 6  ;;  %v736_v40 = vadd.f32 %v706_v1, %v661_v22  ;;  %v889_v56 = vrot.slane %v3923_v59, 3 }
 0x1a7   : > { %v911_v12 = vsel %vm875_vm1, %v909_v43, %v910_v9  ;;  %v1335_v55 = vsel %vm1299_vm5, %v1333_v14, %v1334_v33  ;;  %v1047_v53 = vsel %vm1011_vm2, %v1045_v27, %v1046_v58  ;;  %v1183_v30 = vsel %vm1147_vm3, %v1181_v13, %v1182_v0 }
 0x1a8   : > { %v1211_v28 = vadd.f32 %v1159_v3, %v1075_v45  ;;  %v1259_v35 = vsel %vm1223_vm4, %v1257_v11, %v1258_v46  ;;  %v811_v37 = vadd.f32 %v781_v60, %v736_v40  ;;  %v960_v15 = vmul.f32 0.21300554, %v3664_v23 }
 0x1a9   : > { %v1096_v50 = vmul.f32 0.26601171, %v3664_v23  ;;  %v1313_v22 = vrot.slane %v3923_v59, 7  ;;  %v3935_v9 = vmul.f32 0.036000773, %v3664_v23 }
 0x1aa   : > { %v1287_v19 = vadd.f32 %v1235_v26, %v1211_v28  ;;  %v3938_v33 = vmul.f32 0.007598758, %v3664_v23  ;;  %v3941_v58 = vmul.f32 0.0010283801, %v3664_v23  ;;  %v947_v0 = vadd.f32 %v911_v12, %v811_v37 }
 0x1ab   : > { %v1025_v3 = vrot.slane %v960_v15, 4  ;;  %v1161_v46 = vrot.slane %v1096_v50, 5  ;;  %v1237_v2 = vrot.slane %v960_v15, 6  ;;  %v840_v26 = vmul.f32 0.10936069, %v3666_v25 }
 0x1ac   : > { %4771 = vst [vmem:[#allocation31_spill] sm:$0xff] %v3941_v58  ;;  %v3943_v36 = vadd.f32 %v1311_v29, %v1287_v19  ;;  %v1083_v1 = vadd.f32 %v1047_v53, %v947_v0  ;;  %v3949_v60 = vmul.f32 0.21300554, %v3666_v25  ;;  %v1112_v43 = vmul.f32 0.26601171, %v3666_v25 }
 0x1ad   : > { %v3953_v23 = vmul.f32 0.036000773, %v3666_v25  ;;  %v913_v14 = vrot.slane %v840_v26, 3  ;;  %v1337_v45 = vrot.slane %v840_v26, 7  ;;  %v3956_v29 = vmul.f32 0.007598758, %v3666_v25 }
 0x1ae   : > { %v3959_v27 = vmul.f32 0.0010283801, %v3666_v25  ;;  %v1219_v13 = vadd.f32 %v1183_v30, %v1083_v1  ;;  %v1049_v11 = vrot.slane %v3949_v60, 4  ;;  %v1185_v40 = vrot.slane %v1112_v43, 5 }
 0x1af   : > { %v1261_v12 = vrot.slane %v3949_v60, 6  ;;  %v654_v37 = vmul.f32 0.0010283801, %v3670_v31  ;;  %v669_v15 = vmul.f32 0.007598758, %v3670_v31  ;;  %v3974_v60 = vsel %vm304_vm0, %v3597_v38, 0.0 }
 0x1b0   : > { %4772 = vst [vmem:[#allocation32_spill] sm:$0xff] %v3959_v27  ;;  %v1295_v50 = vadd.f32 %v1259_v35, %v1219_v13  ;;  %v744_v19 = vmul.f32 0.036000773, %v3670_v31  ;;  %v823_v25 = vmul.f32 0.10936069, %v3670_v31 }
 0x1b1   : > { %v959_v30 = vmul.f32 0.21300554, %v3670_v31  ;;  %v699_v0 = vrot.slane %v669_v15, 1  ;;  %v1095_v26 = vmul.f32 0.26601171, %v3670_v31 }
 0x1b2   : > { %v662_v1 = vmul.f32 0.0010283801, %v3672_v34  ;;  %v1371_v43 = vadd.f32 %v1335_v55, %v1295_v50  ;;  %v774_v53 = vrot.slane %v744_v19, 2  ;;  %v888_v54 = vrot.slane %v823_v25, 3 }
 0x1b3   : > { %v1024_v59 = vrot.slane %v959_v30, 4  ;;  %v729_v35 = vadd.f32 %v699_v0, %v654_v37  ;;  %v1160_v13 = vrot.slane %v1095_v26, 5  ;;  %v1236_v28 = vrot.slane %v959_v30, 6 }
 0x1b4   : > { %v1312_v6 = vrot.slane %v823_v25, 7  ;;  %v1401_v27 = vadd.f32 %v3886_v62, %v1371_v43  ;;  %v890_v15 = vsel %vm875_vm1, %v888_v54, %v889_v56  ;;  %v677_v42 = vmul.f32 0.007598758, %v3672_v34 }
 0x1b5   : > { %v1026_v31 = vsel %vm1011_vm2, %v1024_v59, %v1025_v3  ;;  %v804_v41 = vadd.f32 %v774_v53, %v729_v35  ;;  %v1162_v38 = vsel %vm1147_vm3, %v1160_v13, %v1161_v46  ;;  %v1238_v55 = vsel %vm1223_vm4, %v1236_v28, %v1237_v2 }
 0x1b6   : > { %v1314_v50 = vsel %vm1299_vm5, %v1312_v6, %v1313_v22  ;;  %v4773_v37 = vrot.slane %v3891_v8, 1  ;;  %v707_v25 = vrot.slane %v677_v42, 1  ;;  %v752_v62 = vmul.f32 0.036000773, %v3672_v34 }
 0x1b7   : > { %v839_v54 = vmul.f32 0.10936069, %v3672_v34  ;;  %v940_v56 = vadd.f32 %v890_v15, %v804_v41  ;;  %v975_v3 = vmul.f32 0.21300554, %v3672_v34  ;;  %v1111_v59 = vmul.f32 0.26601171, %v3672_v34 }
 0x1b8   : > { %v3985_v19 = vadd.f32 %v4773_v37, %v1401_v27  ;;  %v3992_v46 = vmul.f32 0.10936069, %v3688_v51  ;;  %v737_v2 = vadd.f32 %v707_v25, %v662_v1  ;;  %v782_v28 = vrot.slane %v752_v62, 2 }
 0x1b9   : > { %v912_v22 = vrot.slane %v839_v54, 3  ;;  %v1336_v6 = vrot.slane %v839_v54, 7  ;;  %v1076_v8 = vadd.f32 %v1026_v31, %v940_v56  ;;  %v1048_v27 = vrot.slane %v975_v3, 4 }
 0x1ba   : > { %4774 = vst [vmem:[#allocation33_spill] sm:$0xff] %v3985_v19  ;;  %v1184_v53 = vrot.slane %v1111_v59, 5  ;;  %v1260_v42 = vrot.slane %v975_v3, 6  ;;  %v812_v30 = vadd.f32 %v782_v28, %v737_v2  ;;  %v892_v26 = vrot.slane %v3992_v46, 3 }
 0x1bb   : > { %v914_v0 = vsel %vm875_vm1, %v912_v22, %v913_v14  ;;  %v1338_v41 = vsel %vm1299_vm5, %v1336_v6, %v1337_v45  ;;  %v1212_v43 = vadd.f32 %v1162_v38, %v1076_v8  ;;  %v1050_v34 = vsel %vm1011_vm2, %v1048_v27, %v1049_v11 }
 0x1bc   : > { %v1186_v35 = vsel %vm1147_vm3, %v1184_v53, %v1185_v40  ;;  %v1262_v1 = vsel %vm1223_vm4, %v1260_v42, %v1261_v12  ;;  %v948_v13 = vadd.f32 %v914_v0, %v812_v30  ;;  %v962_v15 = vmul.f32 0.21300554, %v3688_v51 }
 0x1bd   : > { %v1098_v31 = vmul.f32 0.26601171, %v3688_v51  ;;  %v1316_v37 = vrot.slane %v3992_v46, 7  ;;  %v1288_v25 = vadd.f32 %v1238_v55, %v1212_v43  ;;  %v4004_v14 = vmul.f32 0.036000773, %v3688_v51 }
 0x1be   : > { %v4007_v45 = vmul.f32 0.007598758, %v3688_v51  ;;  %v4010_v11 = vmul.f32 0.0010283801, %v3688_v51  ;;  %v1084_v40 = vadd.f32 %v1050_v34, %v948_v13  ;;  %v1028_v38 = vrot.slane %v962_v15, 4 }
 0x1bf   : > { %v1164_v12 = vrot.slane %v1098_v31, 5  ;;  %v1240_v62 = vrot.slane %v962_v15, 6  ;;  %v4012_v54 = vadd.f32 %v1314_v50, %v1288_v25  ;;  %v842_v55 = vmul.f32 0.10936069, %v3690_v61 }
 0x1c0   : > { %4775 = vst [vmem:[#allocation34_spill] sm:$0xff] %v4010_v11  ;;  %v1220_v59 = vadd.f32 %v1186_v35, %v1084_v40  ;;  %v978_v46 = vmul.f32 0.21300554, %v3690_v61  ;;  %v1114_v2 = vmul.f32 0.26601171, %v3690_v61  ;;  %v4041_v40 = vadd.f32 %v3974_v60, %v3901_v44 }
 0x1c1   : > { %v4020_v51 = vmul.f32 0.036000773, %v3690_v61  ;;  %v916_v28 = vrot.slane %v842_v55, 3  ;;  %v1340_v22 = vrot.slane %v842_v55, 7  ;;  %v4023_v6 = vmul.f32 0.007598758, %v3690_v61 }
 0x1c2   : > { %v4026_v50 = vmul.f32 0.0010283801, %v3690_v61  ;;  %v1296_v8 = vadd.f32 %v1262_v1, %v1220_v59  ;;  %v1052_v27 = vrot.slane %v978_v46, 4  ;;  %v1188_v53 = vrot.slane %v1114_v2, 5 }
 0x1c3   : > { %v1264_v42 = vrot.slane %v978_v46, 6  ;;  %v655_v43 = vmul.f32 0.0010283801, %v3704_v49  ;;  %v670_v34 = vmul.f32 0.007598758, %v3704_v49 }
 0x1c4   : > { %4776 = vst [vmem:[#allocation35_spill] sm:$0xff] %v4026_v50  ;;  %v4032_v35 = vadd.f32 %v1338_v41, %v1296_v8  ;;  %v745_v13 = vmul.f32 0.036000773, %v3704_v49  ;;  %v825_v15 = vmul.f32 0.10936069, %v3704_v49 }
 0x1c5   : > { %v961_v61 = vmul.f32 0.21300554, %v3704_v49  ;;  %v700_v1 = vrot.slane %v670_v34, 1  ;;  %v1097_v31 = vmul.f32 0.26601171, %v3704_v49 }
 0x1c6   : > { %v663_v25 = vmul.f32 0.0010283801, %v3706_v16  ;;  %v775_v55 = vrot.slane %v745_v13, 2  ;;  %v891_v59 = vrot.slane %v825_v15, 3  ;;  %v1315_v0 = vrot.slane %v825_v15, 7 }
 0x1c7   : > { %v1027_v46 = vrot.slane %v961_v61, 4  ;;  %v1239_v41 = vrot.slane %v961_v61, 6  ;;  %v730_v2 = vadd.f32 %v700_v1, %v655_v43  ;;  %v1163_v8 = vrot.slane %v1097_v31, 5  ;;  %v4777_v31 = vld [vmem:[#allocation20_spill] sm:$0xff] }
 0x1c8   : > { %v678_v3 = vmul.f32 0.007598758, %v3706_v16  ;;  %v893_v30 = vsel %vm875_vm1, %v891_v59, %v892_v26  ;;  %v753_v56 = vmul.f32 0.036000773, %v3706_v16  ;;  %v1317_v60 = vsel %vm1299_vm5, %v1315_v0, %v1316_v37 }
 0x1c9   : > { %v1029_v34 = vsel %vm1011_vm2, %v1027_v46, %v1028_v38  ;;  %v1241_v49 = vsel %vm1223_vm4, %v1239_v41, %v1240_v62  ;;  %v805_v50 = vadd.f32 %v775_v55, %v730_v2  ;;  %v1165_v44 = vsel %vm1147_vm3, %v1163_v8, %v1164_v12 }
 0x1ca   : > { %v708_v13 = vrot.slane %v678_v3, 1  ;;  %v783_v61 = vrot.slane %v753_v56, 2  ;;  %v841_v43 = vmul.f32 0.10936069, %v3706_v16  ;;  %v977_v15 = vmul.f32 0.21300554, %v3706_v16 }
 0x1cb   : > { %v4054_v26 = vadd.f32 %v3789_v47, %v3874_v63  ;;  %v941_v38 = vadd.f32 %v893_v30, %v805_v50  ;;  %v1113_v62 = vmul.f32 0.26601171, %v3706_v16  ;;  %v4058_v55 = vmul.f32 0.10936069, %v4777_v31 }
 0x1cc   : > { %v738_v1 = vadd.f32 %v708_v13, %v663_v25  ;;  %v915_v12 = vrot.slane %v841_v43, 3  ;;  %v1051_v59 = vrot.slane %v977_v15, 4  ;;  %v1263_v37 = vrot.slane %v977_v15, 6 }
 0x1cd   : > { %v1339_v3 = vrot.slane %v841_v43, 7  ;;  %v1077_v56 = vadd.f32 %v1029_v34, %v941_v38  ;;  %v1187_v46 = vrot.slane %v1113_v62, 5  ;;  %v895_v41 = vrot.slane %v4058_v55, 3 }
 0x1ce   : > { %v813_v0 = vadd.f32 %v783_v61, %v738_v1  ;;  %v917_v2 = vsel %vm875_vm1, %v915_v12, %v916_v28  ;;  %v1053_v47 = vsel %vm1011_vm2, %v1051_v59, %v1052_v27  ;;  %v1265_v63 = vsel %vm1223_vm4, %v1263_v37, %v1264_v42 }
 0x1cf   : > { %v1341_v16 = vsel %vm1299_vm5, %v1339_v3, %v1340_v22  ;;  %v1213_v50 = vadd.f32 %v1165_v44, %v1077_v56  ;;  %v1189_v25 = vsel %vm1147_vm3, %v1187_v46, %v1188_v53  ;;  %v964_v8 = vmul.f32 0.21300554, %v4777_v31 }
 0x1d0   : > { %v949_v30 = vadd.f32 %v917_v2, %v813_v0  ;;  %v1100_v34 = vmul.f32 0.26601171, %v4777_v31  ;;  %v1319_v13 = vrot.slane %v4058_v55, 7  ;;  %v4070_v61 = vmul.f32 0.036000773, %v4777_v31  ;;  %v4779_v55 = vld [vmem:[#allocation21_spill] sm:$0xff] }
 0x1d1   : > { %v4074_v28 = vadd.f32 %v3866_v4, %v3943_v36  ;;  %v1289_v27 = vadd.f32 %v1241_v49, %v1213_v50  ;;  %v1031_v22 = vrot.slane %v964_v8, 4  ;;  %v1243_v44 = vrot.slane %v964_v8, 6 }
 0x1d2   : > { %v1085_v42 = vadd.f32 %v1053_v47, %v949_v30  ;;  %v1167_v43 = vrot.slane %v1100_v34, 5  ;;  %v4077_v53 = vmul.f32 0.007598758, %v4777_v31  ;;  %v4080_v15 = vmul.f32 0.0010283801, %v4777_v31  ;;  %v4781_v47 = vld [vmem:[#allocation22_spill] sm:$0xff] }
 0x1d3   : > { %v4084_v38 = vadd.f32 %v3935_v9, %v4012_v54  ;;  %v1365_v1 = vadd.f32 %v1317_v60, %v1289_v27  ;;  %v4087_v4 = vmul.f32 0.10936069, %v4779_v55  ;;  %v980_v36 = vmul.f32 0.21300554, %v4779_v55 }
 0x1d4   : > { %4778 = vst [vmem:[#allocation20_spill] sm:$0xff] %v4080_v15  ;;  %v1221_v62 = vadd.f32 %v1189_v25, %v1085_v42  ;;  %v1116_v59 = vmul.f32 0.26601171, %v4779_v55  ;;  %v4094_v31 = vmul.f32 0.036000773, %v4779_v55 }
 0x1d5   : > { %v919_v9 = vrot.slane %v4087_v4, 3  ;;  %v1055_v54 = vrot.slane %v980_v36, 4  ;;  %v1267_v60 = vrot.slane %v980_v36, 6  ;;  %v1343_v56 = vrot.slane %v4087_v4, 7 }
 0x1d6   : > { %v1297_v37 = vadd.f32 %v1265_v63, %v1221_v62  ;;  %v1191_v3 = vrot.slane %v1116_v59, 5  ;;  %v4099_v0 = vmul.f32 0.007598758, %v4779_v55  ;;  %v4102_v46 = vmul.f32 0.0010283801, %v4779_v55 }
 0x1d7   : > { %v656_v50 = vmul.f32 0.0010283801, %v4781_v47  ;;  %v671_v30 = vmul.f32 0.007598758, %v4781_v47  ;;  %v746_v63 = vmul.f32 0.036000773, %v4781_v47 }
 0x1d8   : > { %4780 = vst [vmem:[#allocation21_spill] sm:$0xff] %v4102_v46  ;;  %v4104_v2 = vadd.f32 %v1341_v16, %v1297_v37  ;;  %v827_v34 = vmul.f32 0.10936069, %v4781_v47  ;;  %v963_v27 = vmul.f32 0.21300554, %v4781_v47  ;;  %v4782_v16 = vld [vmem:[#allocation23_spill] sm:$0xff] }
 0x1d9   : > { %v701_v42 = vrot.slane %v671_v30, 1  ;;  %v776_v62 = vrot.slane %v746_v63, 2  ;;  %v1099_v55 = vmul.f32 0.26601171, %v4781_v47  ;;  %v664_v4 = vmul.f32 0.0010283801, %v4782_v16 }
 0x1da   : > { %v894_v36 = vrot.slane %v827_v34, 3  ;;  %v1030_v59 = vrot.slane %v963_v27, 4  ;;  %v1242_v37 = vrot.slane %v963_v27, 6  ;;  %v1318_v12 = vrot.slane %v827_v34, 7 }
 0x1db   : > { %v731_v49 = vadd.f32 %v701_v42, %v656_v50  ;;  %v1166_v19 = vrot.slane %v1099_v55, 5  ;;  %v679_v25 = vmul.f32 0.007598758, %v4782_v16  ;;  %v754_v8 = vmul.f32 0.036000773, %v4782_v16 }
 0x1dc   : > { %v896_v46 = vsel %vm875_vm1, %v894_v36, %v895_v41  ;;  %v1032_v15 = vsel %vm1011_vm2, %v1030_v59, %v1031_v22  ;;  %v1244_v30 = vsel %vm1223_vm4, %v1242_v37, %v1243_v44  ;;  %v1320_v47 = vsel %vm1299_vm5, %v1318_v12, %v1319_v13 }
 0x1dd   : > { %v806_v63 = vadd.f32 %v776_v62, %v731_v49  ;;  %v1168_v11 = vsel %vm1147_vm3, %v1166_v19, %v1167_v43  ;;  %v709_v58 = vrot.slane %v679_v25, 1  ;;  %v784_v27 = vrot.slane %v754_v8, 2 }
 0x1de   : > { %v843_v50 = vmul.f32 0.10936069, %v4782_v16  ;;  %v979_v34 = vmul.f32 0.21300554, %v4782_v16  ;;  %v1115_v42 = vmul.f32 0.26601171, %v4782_v16  ;;  %v4126_v55 = vadd.f32 %v4004_v14, %v1365_v1 }
 0x1df   : > { %v942_v41 = vadd.f32 %v896_v46, %v806_v63  ;;  %v739_v22 = vadd.f32 %v709_v58, %v664_v4  ;;  %v830_v44 = vmul.f32 0.10936069, %v3751_v48  ;;  %v966_v13 = vmul.f32 0.21300554, %v3751_v48 }
 0x1e0   : > { %v918_v49 = vrot.slane %v843_v50, 3  ;;  %v1054_v12 = vrot.slane %v979_v34, 4  ;;  %v1190_v19 = vrot.slane %v1115_v42, 5  ;;  %v1266_v43 = vrot.slane %v979_v34, 6 }
 0x1e1   : > { %v1078_v25 = vadd.f32 %v1032_v15, %v942_v41  ;;  %v814_v8 = vadd.f32 %v784_v27, %v739_v22  ;;  %v1342_v62 = vrot.slane %v843_v50, 7  ;;  %v898_v36 = vrot.slane %v830_v44, 3 }
 0x1e2   : > { %v920_v59 = vsel %vm875_vm1, %v918_v49, %v919_v9  ;;  %v1056_v16 = vsel %vm1011_vm2, %v1054_v12, %v1055_v54  ;;  %v1192_v14 = vsel %vm1147_vm3, %v1190_v19, %v1191_v3  ;;  %v1268_v58 = vsel %vm1223_vm4, %v1266_v43, %v1267_v60  ;;  %v4783_v60 = vld [vmem:[#allocation25_spill] sm:$0xff] }
 0x1e3   : > { %v1214_v1 = vadd.f32 %v1168_v11, %v1078_v25  ;;  %v950_v46 = vadd.f32 %v920_v59, %v814_v8  ;;  %v1344_v4 = vsel %vm1299_vm5, %v1342_v62, %v1343_v56  ;;  %v1034_v37 = vrot.slane %v966_v13, 4 }
 0x1e4   : > { %v1102_v63 = vmul.f32 0.26601171, %v3751_v48  ;;  %v1246_v34 = vrot.slane %v966_v13, 6  ;;  %v1322_v15 = vrot.slane %v830_v44, 7  ;;  %v4137_v27 = vmul.f32 0.036000773, %v3751_v48 }
 0x1e5   : > { %v1290_v50 = vadd.f32 %v1244_v30, %v1214_v1  ;;  %v1086_v9 = vadd.f32 %v1056_v16, %v950_v46  ;;  %v4140_v54 = vmul.f32 0.007598758, %v3751_v48  ;;  %v4143_v3 = vmul.f32 0.0010283801, %v3751_v48 }
 0x1e6   : > { %v1170_v11 = vrot.slane %v1102_v63, 5  ;;  %v657_v42 = vmul.f32 0.0010283801, %v4783_v60  ;;  %v672_v56 = vmul.f32 0.007598758, %v4783_v60  ;;  %v1402_v41 = vadd.f32 %v3953_v23, %v4032_v35 }
 0x1e7   : > { %v1366_v22 = vadd.f32 %v1320_v47, %v1290_v50  ;;  %v1222_v44 = vadd.f32 %v1192_v14, %v1086_v9  ;;  %v1442_v13 = vrot.slane %v4140_v54, 1  ;;  %v1517_v30 = vrot.slane %v4143_v3, 2 }
 0x1e8   : > { %v702_v49 = vrot.slane %v672_v56, 1  ;;  %v747_v12 = vmul.f32 0.036000773, %v4783_v60  ;;  %v829_v48 = vmul.f32 0.10936069, %v4783_v60  ;;  %v1403_v19 = vadd.f32 %v4020_v51, %v4104_v2 }
 0x1e9   : > { %v1396_v43 = vadd.f32 %v4070_v61, %v1366_v22  ;;  %v1298_v25 = vadd.f32 %v1268_v58, %v1222_v44  ;;  %v965_v8 = vmul.f32 0.21300554, %v4783_v60  ;;  %v1101_v23 = vmul.f32 0.26601171, %v4783_v60 }
 0x1ea   : > { %v732_v35 = vadd.f32 %v702_v49, %v657_v42  ;;  %v777_v47 = vrot.slane %v747_v12, 2  ;;  %v897_v62 = vrot.slane %v829_v48, 3  ;;  %v1321_v59 = vrot.slane %v829_v48, 7 }
 0x1eb   : > { %v4784_v16 = vrot.slane %v4077_v53, 1  ;;  %v1374_v1 = vadd.f32 %v1344_v4, %v1298_v25  ;;  %v1033_v46 = vrot.slane %v965_v8, 4  ;;  %v1169_v63 = vrot.slane %v1101_v23, 5 }
 0x1ec   : > { %v807_v50 = vadd.f32 %v777_v47, %v732_v35  ;;  %v899_v51 = vsel %vm875_vm1, %v897_v62, %v898_v36  ;;  %v1245_v2 = vrot.slane %v965_v8, 6  ;;  %v1323_v61 = vsel %vm1299_vm5, %v1321_v59, %v1322_v15 }
 0x1ed   : > { %v1471_v14 = vadd.f32 %v4784_v16, %v1396_v43  ;;  %v1035_v58 = vsel %vm1011_vm2, %v1033_v46, %v1034_v37  ;;  %v1171_v9 = vsel %vm1147_vm3, %v1169_v63, %v1170_v11  ;;  %v4785_v60 = vsub.f32 %v3530_v18, %v3533_v20  ;;  %v4788_v18 = vld [vmem:[#allocation18_spill] sm:$0xff] }
 0x1ee   : > { %v4786_v53 = vsub.f32 %v3507_v5, %v3536_v21  ;;  %v943_v56 = vadd.f32 %v899_v51, %v807_v50  ;;  %v1247_v22 = vsel %vm1223_vm4, %v1245_v2, %v1246_v34  ;;  %v4787_v36 = vsub.f32 %v3516_v10, %v3549_v24  ;;  %v4807_v2 = vld [vmem:[#allocation20_spill] sm:$0xff] }
 0x1ef   : > { %v301_v42 = vand.u32 2147483647, %v4785_v60  ;;  %v1404_v15 = vadd.f32 %v4094_v31, %v1374_v1  ;;  %v4789_v20 = vrot.slane %v4788_v18, 1  ;;  %v4790_v5 = vrot.slane %v3792_v7, 1  ;;  %v4810_v60 = vld [vmem:[#allocation17_spill] sm:$0xff] }
 0x1f0   : > { %v302_v4 = vand.u32 2147483647, %v4786_v53  ;;  %v303_v44 = vand.u32 2147483647, %v4787_v36  ;;  %v1079_v12 = vadd.f32 %v1035_v58, %v943_v56  ;;  %v4791_v24 = vrot.slane %v3869_v39, 1  ;;  %v4815_v36 = vld [vmem:[#allocation30_spill] sm:$0xff] }
 0x1f1   : > { %v310_v37 = vsel %vm304_vm0, %v301_v42, 0.0  ;;  %v1466_v49 = vadd.f32 %v4789_v20, %v3814_v32  ;;  %v1467_v21 = vadd.f32 %v4790_v5, %v4054_v26  ;;  %v4792_v48 = vrot.slane %v3938_v33, 1  ;;  %v4821_v5 = vld [vmem:[#allocation32_spill] sm:$0xff] }
 0x1f2   : > { %v312_v11 = vsel %vm304_vm0, %v302_v4, 0.0  ;;  %v311_v34 = vadd.f32 %v310_v37, %v4041_v40  ;;  %v314_v10 = vsel %vm304_vm0, %v303_v44, 0.0  ;;  %v1468_v31 = vadd.f32 %v4791_v24, %v4074_v28  ;;  %v4797_v28 = vld [vmem:[#allocation16_spill] sm:$0xff]  ;;  %v4816_v44 = vld [vmem:[#allocation27_spill] sm:$0xff]  ;;  %v4825_v24 = vld [vmem:[#allocation21_spill] sm:$0xff] }
 0x1f3   : > { %v1469_v43 = vadd.f32 %v4792_v48, %v4084_v38  ;;  %v4793_v32 = vrot.slane %v4007_v45, 1  ;;  %v4794_v7 = vrot.slane %v3956_v29, 1  ;;  %v4795_v8 = vrot.slane %v4023_v6, 1  ;;  %v4799_v38 = vld [vmem:[#allocation19_spill] sm:$0xff]  ;;  %v4813_v4 = vld [vmem:[#allocation24_spill] sm:$0xff] }
 0x1f4   : > { %v1215_v23 = vadd.f32 %v1171_v9, %v1079_v12  ;;  %v313_v35 = vadd.f32 %v312_v11, %v311_v34  ;;  %v4796_v47 = vrot.slane %v4099_v0, 1  ;;  %v4798_v62 = vrot.slane %v4797_v28, 2  ;;  %v4803_v6 = vld [vmem:[#allocation31_spill] sm:$0xff]  ;;  %v4805_v0 = vld [vmem:[#allocation34_spill] sm:$0xff]  ;;  %v4819_v11 = vld [vmem:[#allocation29_spill] sm:$0xff] }
 0x1f5   : > { %v1470_v25 = vadd.f32 %v4793_v32, %v4126_v55  ;;  %v1477_v26 = vadd.f32 %v4794_v7, %v1402_v41  ;;  %v1478_v40 = vadd.f32 %v4795_v8, %v1403_v19  ;;  %v4800_v59 = vrot.slane %v4799_v38, 2  ;;  %v4809_v9 = vld [vmem:[#allocation26_spill] sm:$0xff]  ;;  %v4823_v12 = vld [vmem:[#allocation35_spill] sm:$0xff] }
 0x1f6   : > { %v1479_v39 = vadd.f32 %v4796_v47, %v1404_v15  ;;  %v1540_v33 = vadd.f32 %v4798_v62, %v3777_v17  ;;  %v4801_v45 = vrot.slane %v3798_v57, 2  ;;  %v4802_v29 = vrot.slane %v3872_v52, 2  ;;  %v4812_v57 = vld [vmem:[#allocation28_spill] sm:$0xff] }
 0x1f7   : > { %v1541_v16 = vadd.f32 %v4800_v59, %v1466_v49  ;;  %v4804_v19 = vrot.slane %v4803_v6, 2  ;;  %v1291_v46 = vadd.f32 %v1247_v22, %v1215_v23  ;;  %v315_v63 = vadd.f32 %v314_v10, %v313_v35  ;;  %v4818_v22 = vld [vmem:[#allocation33_spill] sm:$0xff] }
 0x1f8   : > { %v1542_v55 = vadd.f32 %v4801_v45, %v1467_v21  ;;  %v1543_v41 = vadd.f32 %v4802_v29, %v1468_v31  ;;  %v4806_v50 = vrot.slane %v4805_v0, 2  ;;  %v4808_v58 = vrot.slane %v4807_v2, 2 }
 0x1f9   : > { %v1544_v1 = vadd.f32 %v4804_v19, %v1469_v43  ;;  %v4811_v42 = vrot.slane %v4810_v60, 2  ;;  %v4814_v56 = vrot.slane %v4813_v4, 2  ;;  %v4817_v15 = vrot.slane %v4816_v44, 2  ;;  %316 = vadd.xlane.f32.xlu0 %v315_v63 }
 0x1fa   : > { %v1545_v51 = vadd.f32 %v4806_v50, %v1470_v25  ;;  %v1546_v17 = vadd.f32 %v4808_v58, %v1471_v14  ;;  %v4820_v18 = vrot.slane %v4819_v11, 2  ;;  %v1367_v49 = vadd.f32 %v1323_v61, %v1291_v46 }
 0x1fb   : > { %v1548_v53 = vadd.f32 %v4811_v42, %v4809_v9  ;;  %v1549_v52 = vadd.f32 %v4814_v56, %v4812_v57  ;;  %v1550_v37 = vadd.f32 %v4817_v15, %v4815_v36  ;;  %v4822_v14 = vrot.slane %v4821_v5, 2 }
 0x1fc   : > { %v1551_v20 = vadd.f32 %v4820_v18, %v4818_v22  ;;  %v4824_v34 = vrot.slane %v4823_v12, 2  ;;  %v4826_v31 = vrot.slane %v4825_v24, 2  ;;  %v1555_v43 = vmul.f32 %v1540_v33, %v1540_v33 }
 0x1fd   : > { %v1552_v21 = vadd.f32 %v4822_v14, %v1477_v26  ;;  %v1556_v32 = vmul.f32 %v1541_v16, %v1541_v16  ;;  %v1557_v25 = vmul.f32 %v1542_v55, %v1542_v55  ;;  %v1561_v7 = vmul.f32 %v1543_v41, %v1543_v41 }
 0x1fe   : > { %v1553_v10 = vadd.f32 %v4824_v34, %v1478_v40  ;;  %v1554_v48 = vadd.f32 %v4826_v31, %v1479_v39  ;;  %v1397_v8 = vadd.f32 %v4137_v27, %v1367_v49  ;;  %v1562_v23 = vmul.f32 %v1544_v1, %v1544_v1 }
 0x1ff   : > { %v1563_v35 = vmul.f32 %v1545_v51, %v1545_v51  ;;  %v1567_v47 = vmul.f32 %v1543_v41, %v1540_v33  ;;  %v1558_v61 = vsub.f32 %v1546_v17, %v1555_v43  ;;  %v1560_v28 = vsub.f32 %v1548_v53, %v1557_v25 }
 0x200   : > { %v1564_v62 = vsub.f32 %v1549_v52, %v1561_v7  ;;  %v1568_v38 = vmul.f32 %v1544_v1, %v1541_v16  ;;  %v1472_v26 = vadd.f32 %v1442_v13, %v1397_v8  ;;  %v1565_v40 = vsub.f32 %v1550_v37, %v1562_v23 }
 0x201   : > { %v1566_v59 = vsub.f32 %v1551_v20, %v1563_v35  ;;  %v1569_v45 = vmul.f32 %v1545_v51, %v1542_v55  ;;  %v1570_v39 = vsub.f32 %v1552_v21, %v1567_v47  ;;  %v1573_v6 = vmul.f32 2.0, %v1540_v33 }
 0x202   : > { %v1571_v29 = vsub.f32 %v1553_v10, %v1568_v38  ;;  %v1574_v19 = vmul.f32 2.0, %v1541_v16  ;;  %v1547_v27 = vadd.f32 %v1517_v30, %v1472_v26  ;;  %v1575_v63 = vmul.f32 2.0, %v1542_v55 }
 0x203   : > { %v1572_v46 = vsub.f32 %v1554_v48, %v1569_v45  ;;  %v1591_v0 = vadd.f32 %v1561_v7, %v1555_v43  ;;  %v1576_v50 = vmul.f32 %v1573_v6, %v1543_v41  ;;  %v1582_v58 = vmul.f32 2.0, %v1570_v39 }
 0x204   : > { %v1577_v2 = vmul.f32 %v1574_v19, %v1544_v1  ;;  %v1583_v17 = vmul.f32 2.0, %v1571_v29  ;;  %v1559_v9 = vsub.f32 %v1547_v27, %v1556_v32  ;;  %v1578_v54 = vmul.f32 %v1575_v63, %v1545_v51 }
 0x205   : > { %v1584_v13 = vmul.f32 2.0, %v1572_v46  ;;  %v1592_v60 = vadd.f32 %v1562_v23, %v1556_v32  ;;  %v1579_v42 = vadd.f32 0.0001, %v1576_v50  ;;  %v1585_v57 = vadd.f32 0.0009, %v1582_v58 }
 0x206   : > { %v1580_v53 = vadd.f32 0.0001, %v1577_v2  ;;  %v1593_v4 = vadd.f32 %v1563_v35, %v1557_v25  ;;  %v1581_v33 = vadd.f32 0.0001, %v1578_v54  ;;  %v1586_v16 = vadd.f32 0.0009, %v1583_v17 }
 0x207   : > { %v1587_v56 = vadd.f32 0.0009, %v1584_v13  ;;  %v1597_v3 = vadd.f32 %v1564_v62, %v1558_v61  ;;  %v1588_v30 = vmul.f32 %v1585_v57, %v1579_v42  ;;  %v1598_v36 = vadd.f32 %v1565_v40, %v1559_v9 }
 0x208   : > { %v1589_v52 = vmul.f32 %v1586_v16, %v1580_v53  ;;  %v1599_v41 = vadd.f32 %v1566_v59, %v1560_v28  ;;  %v1594_v1 = vadd.f32 0.0001, %v1591_v0  ;;  %v1595_v44 = vadd.f32 0.0001, %v1592_v60 }
 0x209   : > { %v1590_v55 = vmul.f32 %v1587_v56, %v1581_v33  ;;  %v1600_v15 = vadd.f32 0.0009, %v1597_v3  ;;  %v1596_v37 = vadd.f32 0.0001, %v1593_v4  ;;  %v1601_v51 = vadd.f32 0.0009, %v1598_v36 }
 0x20a   : > { %v1602_v22 = vadd.f32 0.0009, %v1599_v41  ;;  %v1627_v32 = vlaneseq  ;;  %v4252_v6 = vmov 0.0   ;;  %v4254_v19 = vmov 0.0  }
 0x20b   : > { %v1603_v11 = vmul.f32 %v1600_v15, %v1594_v1  ;;  %v1604_v18 = vmul.f32 %v1601_v51, %v1595_v44 }
 0x20c   : > { %v1605_v20 = vmul.f32 %v1602_v22, %v1596_v37  ;;  %v4240_v25 = vshrl.u32 %v1627_v32, 7 }
 0x20d   : > { %2877 = vrcp.f32 %v1603_v11 }
 0x20e   : > { %2879 = vrcp.f32 %v1604_v18  ;;  %v4243_v7 = vadd.s32 8, %v4240_v25 }
 0x20f   : > { %2881 = vrcp.f32 %v1605_v20 }
 0x217   : > { %v2878_v49 = vpop.eup %2877 }
 0x218   : > { %v2880_v5 = vpop.eup %2879  ;;  %v1607_v14 = vmul.f32 %v2878_v49, %v1588_v30 }
 0x219   : > { %v2882_v21 = vpop.eup %2881  ;;  %v1609_v12 = vmul.f32 %v2880_v5, %v1589_v52 }
 0x21a   : > { %v1611_v34 = vmul.f32 %v2882_v21, %v1590_v55  ;;  %v1613_v10 = vsel %vm1612_vm6, %v1607_v14, 0.0 }
 0x21b   : > { %v1614_v24 = vsel %vm1612_vm6, %v1609_v12, 0.0 }
 0x21c   : > { %v1615_v31 = vadd.f32 %v1614_v24, %v1613_v10  ;;  %v1616_v48 = vsel %vm1612_vm6, %v1611_v34, 0.0 }
 0x21e   : > { %v1617_v43 = vadd.f32 %v1616_v48, %v1615_v31 }
 0x220   : > { %1618 = vadd.xlane.f32.xlu0 %v1617_v43 }
 0x286   : > { %v317_v8 = vpop.xlane.xlu0 %316 }
 0x287   : > { %v318_v23 = vrot.slane %v317_v8, 4 }
 0x289   : > { %v319_v35 = vadd.f32 %v318_v23, %v317_v8 }
 0x28b   : > { %v320_v47 = vrot.slane %v319_v35, 2 }
 0x28d   : > { %v321_v61 = vadd.f32 %v320_v47, %v319_v35 }
 0x28f   : > { %v322_v28 = vrot.slane %v321_v61, 1 }
 0x291   : > { %v323_v62 = vadd.f32 %v322_v28, %v321_v61 }
 0x293   : > { %2766 = vpush %v323_v62 }
 0x2ad   : > { %v1619_v38 = vpop.xlane.xlu0 %1618 }
 0x2ae   : > { %v1620_v26 = vrot.slane %v1619_v38, 4 }
 0x2b0   : > { %v1621_v40 = vadd.f32 %v1620_v26, %v1619_v38 }
 0x2b2   : > { %v1622_v59 = vrot.slane %v1621_v40, 2 }
 0x2b4   : > { %v1623_v45 = vadd.f32 %v1622_v59, %v1621_v40 }
 0x2b6   : > { %v1624_v39 = vrot.slane %v1623_v45, 1 }
 0x2b8   : > { %v1625_v29 = vadd.f32 %v1624_v39, %v1623_v45 }
 0x2ba   : > { %2768 = vpush %v1625_v29 }
 0x2c4   : > { %s4245_s28 = spop %2766 }
 0x2eb   : > { %s4247_s8 = spop %2768 }
 0x2ec LB: >> { %s2596_s14 = sshll.u32 %s3241_s29, 3  ;;  %v4277_v52 = vsub.s32 6, %v4240_v25  ;;  %v4280_v55 = vsub.s32 5, %v4240_v25  ;;  %v4285_v1 = vsub.s32 7, %v4240_v25  ;;  %v4288_v44 = vsub.s32 1, %v4240_v25  ;;  %s3249_s26 = smov 64   ;;  %s3241_s29 = sphi %s4256_s29, %s1635_s29   ;;  %v3237_v19 = vphi %v4254_v19, %v4828_v19   ;;  %v3233_v6 = vphi %v4252_v6, %v4827_v6  }
 0x2ed   : >> { %s1639_s6 = scalar_lea.vmem %s3481_s11, %s2596_s14 [#allocation2]  ;;  %s1650_s7 = scalar_lea.vmem %s3488_s13, %s2596_s14 [#allocation5]  ;;  %v4291_v15 = vsub.s32 4, %v4240_v25  ;;  %v4296_v51 = vsub.s32 2, %v4240_v25  ;;  %v4299_v22 = vsub.s32 0, %v4240_v25  ;;  %v4302_v11 = vsub.s32 3, %v4240_v25 }
 0x2ee   : >> { %v1640_v27 = vld [vmem:[%s1639_s6] sm:$0xff]  ;;  %v1641_v46 = vld [vmem:[%s1639_s6 + $0x10] sm:$0xff]  ;;  %v3248_v31 = vmov 0.0   ;;  %s3250_s20 = smov 32   ;;  %s3251_s25 = smov 96  }
 0x2ef   : >> { %v1642_v63 = vld [vmem:[%s1639_s6 + $0x20] sm:$0xff]  ;;  %v1643_v0 = vsel %vm304_vm0, %v1640_v27, 0.0  ;;  %v1644_v50 = vsel %vm304_vm0, %v1641_v46, 0.0  ;;  %v1652_v17 = vld [vmem:[%s1650_s7 + $0x10] sm:$0xff]  ;;  %s3252_s10 = smov 16   ;;  %s3253_s12 = smov 48  }
 0x2f0   : >> { %v1646_v2 = vsel %vm304_vm0, %v1642_v63, 0.0  ;;  %v1651_v58 = vld [vmem:[%s1650_s7] sm:$0xff]  ;;  %v1645_v54 = vadd.f32 %v1644_v50, %v1643_v0  ;;  %v1655_v60 = vsel %vm304_vm0, %v1652_v17, 0.0  ;;  %s3254_s23 = smov 80   ;;  %s3255_s21 = smov 112  }
 0x2f1   : >> { %v1653_v9 = vld [vmem:[%s1650_s7 + $0x20] sm:$0xff]  ;;  %v1654_v13 = vsel %vm304_vm0, %v1651_v58, 0.0  ;;  %s1635_s29 = sadd.s32 1, %s3241_s29  }
 0x2f2   : >> { %v1657_v42 = vsel %vm304_vm0, %v1653_v9, 0.0  ;;  %v1656_v53 = vadd.f32 %v1655_v60, %v1654_v13  ;;  %v1647_v57 = vadd.f32 %v1646_v2, %v1645_v54  ;;  %p1632_p3 = scmp.ge.s32.totalorder %s1635_s29, 2  }
 0x2f3   : > { %s2667_s14 = sshll.u32 (%p1632_p3), %s3306_s19, 8  ;;  %s2396_s13 = sshll.u32 (%p1632_p3), %s4249_s9, 4  ;;  %s4637_s13 = int_to_ptr.vmem [resolvable:$true] %s2396_s13 }
 0x2f4   : >> { %v1658_v4 = vadd.f32 %v1657_v42, %v1656_v53  ;;  %v1649_v33 = vmul.f32 0.33333334, %v1647_v57  ;;  %s4634_s11 = scalar_lea.hbm (%p1632_p3), %s4712_s3, %s2667_s14  ;;  %s2379_s7 = scalar_lea.sflag (%p1632_p3), [#allocation4], %s3477_s0 }
 0x2f6   : >> { %v1659_v16 = vmul.f32 0.33333334, %v1658_v4  ;;  %v1660_v56 = vmul.f32 255.0, %v1649_v33 }
 0x2f8   : >> { %v1662_v3 = vmul.f32 255.0, %v1659_v16  ;;  %v2770_v30 = vtrunc.f32 %v1660_v56 }
 0x2fa   : >> { %v2772_v36 = vtrunc.f32 %v1662_v3  ;;  %v4282_v41 = vcvt.f32.s32 %v2770_v30 }
 0x2fc   : >> { %v4293_v37 = vcvt.f32.s32 %v2772_v36  ;;  %v4305_v18 = vand.u32 15, %v4282_v41 }
 0x2fe   : >> { %v4308_v20 = vand.u32 15, %v4293_v37  ;;  %v1933_v49 = vrot.slane %v4305_v18, %v4277_v52  ;;  %v1891_v5 = vrot.slane %v4305_v18, %v4280_v55  ;;  %v1975_v14 = vrot.slane %v4305_v18, %v4285_v1 }
 0x2ff   : >> { %v1723_v21 = vrot.slane %v4305_v18, %v4288_v44  ;;  %v1765_v34 = vrot.slane %v4305_v18, %v4296_v51  ;;  %v1807_v24 = vrot.slane %v4305_v18, %v4302_v11  ;;  %v4376_v33 = vshra.s32 %v4293_v37, 4 }
 0x300   : >> { %v1869_v12 = vrot.slane %v4308_v20, %v4291_v15  ;;  %v1701_v10 = vrot.slane %v4308_v20, %v4299_v22  ;;  %vm1934_vm7 = vcmp.eq.s32.totalorder %v1933_v49, %v4240_v25  ;;  %vm1935_vm8 = vcmp.eq.s32.totalorder %v1933_v49, %v4243_v7 }
 0x301   : >> { %vm1892_vm9 = vcmp.eq.s32.totalorder %v1891_v5, %v4240_v25  ;;  %vm1893_vm10 = vcmp.eq.s32.totalorder %v1891_v5, %v4243_v7  ;;  %v2647_v48 = vsel %vm1934_vm7, 1.0, %v3248_v31  ;;  %v2648_v43 = vsel %vm1935_vm8, 1.0, %v3248_v31 }
 0x302   : >> { %v2639_v8 = vsel %vm1892_vm9, 1.0, %v3248_v31  ;;  %v2640_v23 = vsel %vm1893_vm10, 1.0, %v3248_v31  ;;  %v2893_v35 = vpack.i.bf16 %v2648_v43, %v2647_v48  ;;  %vm1976_vm11 = vcmp.eq.s32.totalorder %v1975_v14, %v4240_v25 }
 0x303   : >> { %v2883_v47 = vpack.i.bf16 %v2640_v23, %v2639_v8  ;;  %vm1977_vm12 = vcmp.eq.s32.totalorder %v1975_v14, %v4243_v7  ;;  %v2655_v61 = vsel %vm1976_vm11, 1.0, %v3248_v31  ;;  %vm1724_vm13 = vcmp.eq.s32.totalorder %v1723_v21, %v4240_v25 }
 0x304   : >> { %v2656_v28 = vsel %vm1977_vm12, 1.0, %v3248_v31  ;;  %vm1725_vm14 = vcmp.eq.s32.totalorder %v1723_v21, %v4243_v7  ;;  %2894 = vrot.lane.b32.xlu0 %v2893_v35, %s3249_s26  ;;  %v2607_v38 = vsel %vm1724_vm13, 1.0, %v3248_v31  ;;  %vm1870_vm15 = vcmp.eq.s32.totalorder %v1869_v12, %v4240_v25 }
 0x305   : >> { %2884 = vrot.lane.b32.xlu1 %v2883_v47, %s3250_s20  ;;  %v2903_v62 = vpack.i.bf16 %v2656_v28, %v2655_v61  ;;  %v2608_v26 = vsel %vm1725_vm14, 1.0, %v3248_v31  ;;  %vm1871_vm1 = vcmp.eq.s32.totalorder %v1869_v12, %v4243_v7  ;;  %v2635_v59 = vsel %vm1870_vm15, 1.0, %v3248_v31 }
 0x306   : >> { %v2888_v40 = vpack.i.bf16 %v2608_v26, %v2607_v38  ;;  %vm1766_vm2 = vcmp.eq.s32.totalorder %v1765_v34, %v4240_v25  ;;  %v2636_v45 = vsel %vm1871_vm1, 1.0, %v3248_v31  ;;  %v1876_v39 = vsub.f32 0.0, %v2635_v59 }
 0x307   : >> { %vm1767_vm3 = vcmp.eq.s32.totalorder %v1765_v34, %v4243_v7  ;;  %v2615_v29 = vsel %vm1766_vm2, 1.0, %v3248_v31  ;;  %v1877_v27 = vsub.f32 0.0, %v2636_v45  ;;  %vm1702_vm4 = vcmp.eq.s32.totalorder %v1701_v10, %v4240_v25 }
 0x308   : >> { %v2616_v46 = vsel %vm1767_vm3, 1.0, %v3248_v31  ;;  %vm1703_vm5 = vcmp.eq.s32.totalorder %v1701_v10, %v4243_v7  ;;  %2904 = vrot.lane.b32.xlu0 %v2903_v62, %s3251_s25  ;;  %v2603_v0 = vsel %vm1702_vm4, 1.0, %v3248_v31  ;;  %vm1808_vm6 = vcmp.eq.s32.totalorder %v1807_v24, %v4240_v25 }
 0x309   : >> { %2889 = vrot.lane.b32.xlu1 %v2888_v40, %s3250_s20  ;;  %v2898_v63 = vpack.i.bf16 %v2616_v46, %v2615_v29  ;;  %v2604_v50 = vsel %vm1703_vm5, 1.0, %v3248_v31  ;;  %v2913_v2 = vpack.i.bf16 %v1877_v27, %v1876_v39  ;;  %v1708_v58 = vsub.f32 0.0, %v2603_v0 }
 0x30a   : >> { %v1709_v17 = vsub.f32 0.0, %v2604_v50  ;;  %vm1809_vm7 = vcmp.eq.s32.totalorder %v1807_v24, %v4243_v7  ;;  %v2623_v9 = vsel %vm1808_vm6, 1.0, %v3248_v31  ;;  %v1911_v13 = vrot.slane %v4308_v20, %v4280_v55 }
 0x30b   : >> { %v2624_v54 = vsel %vm1809_vm7, 1.0, %v3248_v31  ;;  %v1743_v60 = vrot.slane %v4308_v20, %v4288_v44  ;;  %v1953_v57 = vrot.slane %v4308_v20, %v4277_v52  ;;  %v1785_v4 = vrot.slane %v4308_v20, %v4296_v51 }
 0x30c   : >> { %v2918_v42 = vpack.i.bf16 %v1709_v17, %v1708_v58  ;;  %v2908_v53 = vpack.i.bf16 %v2624_v54, %v2623_v9  ;;  %2914 = vrot.lane.b32.xlu0 %v2913_v2, %s3252_s10  ;;  %vm1912_vm8 = vcmp.eq.s32.totalorder %v1911_v13, %v4240_v25  ;;  %vm1913_vm9 = vcmp.eq.s32.totalorder %v1911_v13, %v4243_v7 }
 0x30d   : >> { %2899 = vrot.lane.b32.xlu1 %v2898_v63, %s3249_s26  ;;  %vm1744_vm10 = vcmp.eq.s32.totalorder %v1743_v60, %v4240_v25  ;;  %v2643_v16 = vsel %vm1912_vm8, 1.0, %v3248_v31  ;;  %v2644_v56 = vsel %vm1913_vm9, 1.0, %v3248_v31  ;;  %vm1745_vm11 = vcmp.eq.s32.totalorder %v1743_v60, %v4243_v7 }
 0x30e   : >> { %v2611_v3 = vsel %vm1744_vm10, 1.0, %v3248_v31  ;;  %v1918_v30 = vsub.f32 0.0, %v2643_v16  ;;  %v1919_v36 = vsub.f32 0.0, %v2644_v56  ;;  %v2612_v49 = vsel %vm1745_vm11, 1.0, %v3248_v31 }
 0x30f   : >> { %v1750_v5 = vsub.f32 0.0, %v2611_v3  ;;  %v1751_v14 = vsub.f32 0.0, %v2612_v49  ;;  %vm1954_vm12 = vcmp.eq.s32.totalorder %v1953_v57, %v4240_v25  ;;  %vm1955_vm13 = vcmp.eq.s32.totalorder %v1953_v57, %v4243_v7 }
 0x310   : >> { %vm1786_vm14 = vcmp.eq.s32.totalorder %v1785_v4, %v4240_v25  ;;  %2919 = vrot.lane.b32.xlu0 %v2918_v42, %s3252_s10  ;;  %v2923_v37 = vpack.i.bf16 %v1919_v36, %v1918_v30  ;;  %v2651_v21 = vsel %vm1954_vm12, 1.0, %v3248_v31  ;;  %v2652_v12 = vsel %vm1955_vm13, 1.0, %v3248_v31 }
 0x311   : >> { %2909 = vrot.lane.b32.xlu1 %v2908_v53, %s3251_s25  ;;  %vm1787_vm15 = vcmp.eq.s32.totalorder %v1785_v4, %v4243_v7  ;;  %v2928_v34 = vpack.i.bf16 %v1751_v14, %v1750_v5  ;;  %v1960_v10 = vsub.f32 0.0, %v2651_v21  ;;  %v1961_v24 = vsub.f32 0.0, %v2652_v12 }
 0x312   : >> { %v2619_v48 = vsel %vm1786_vm14, 1.0, %v3248_v31  ;;  %v2620_v43 = vsel %vm1787_vm15, 1.0, %v3248_v31  ;;  %v1995_v23 = vrot.slane %v4308_v20, %v4285_v1  ;;  %v1827_v35 = vrot.slane %v4308_v20, %v4302_v11 }
 0x313   : >> { %v1792_v8 = vsub.f32 0.0, %v2619_v48  ;;  %v2933_v47 = vpack.i.bf16 %v1961_v24, %v1960_v10  ;;  %v1793_v61 = vsub.f32 0.0, %v2620_v43  ;;  %v1859_v28 = vrot.slane %v4376_v33, %v4291_v15 }
 0x314   : >> { %v1691_v62 = vrot.slane %v4376_v33, %v4299_v22  ;;  %2924 = vrot.lane.b32.xlu0 %v2923_v37, %s3253_s12  ;;  %vm1996_vm1 = vcmp.eq.s32.totalorder %v1995_v23, %v4240_v25  ;;  %vm1997_vm2 = vcmp.eq.s32.totalorder %v1995_v23, %v4243_v7  ;;  %vm1828_vm3 = vcmp.eq.s32.totalorder %v1827_v35, %v4240_v25 }
 0x315   : >> { %2929 = vrot.lane.b32.xlu1 %v2928_v34, %s3253_s12  ;;  %v4407_v20 = vshra.s32 %v4282_v41, 4  ;;  %v2938_v38 = vpack.i.bf16 %v1793_v61, %v1792_v8  ;;  %v2659_v26 = vsel %vm1996_vm1, 1.0, %v3248_v31  ;;  %v2660_v40 = vsel %vm1997_vm2, 1.0, %v3248_v31 }
 0x316   : >> { %vm1829_vm4 = vcmp.eq.s32.totalorder %v1827_v35, %v4243_v7  ;;  %v2002_v59 = vsub.f32 0.0, %v2659_v26  ;;  %v2003_v45 = vsub.f32 0.0, %v2660_v40  ;;  %v2627_v39 = vsel %vm1828_vm3, 1.0, %v3248_v31 }
 0x317   : >> { %v2628_v29 = vsel %vm1829_vm4, 1.0, %v3248_v31  ;;  %v1834_v27 = vsub.f32 0.0, %v2627_v39  ;;  %vm1860_vm5 = vcmp.eq.s32.totalorder %v1859_v28, %v4240_v25  ;;  %vm1861_vm6 = vcmp.eq.s32.totalorder %v1859_v28, %v4243_v7 }
 0x318   : >> { %v1835_v46 = vsub.f32 0.0, %v2628_v29  ;;  %2934 = vrot.lane.b32.xlu0 %v2933_v47, %s3254_s23  ;;  %v2943_v41 = vpack.i.bf16 %v2003_v45, %v2002_v59  ;;  %v2633_v63 = vsel %vm1860_vm5, 1.0, %v3248_v31  ;;  %v2634_v0 = vsel %vm1861_vm6, 1.0, %v3248_v31 }
 0x319   : >> { %2939 = vrot.lane.b32.xlu1 %v2938_v38, %s3254_s23  ;;  %vm1692_vm7 = vcmp.eq.s32.totalorder %v1691_v62, %v4240_v25  ;;  %v2948_v2 = vpack.i.bf16 %v2634_v0, %v2633_v63  ;;  %vm1693_vm8 = vcmp.eq.s32.totalorder %v1691_v62, %v4243_v7  ;;  %v1881_v9 = vrot.slane %v4407_v20, %v4280_v55 }
 0x31a   : >> { %v2953_v50 = vpack.i.bf16 %v1835_v46, %v1834_v27  ;;  %v2601_v58 = vsel %vm1692_vm7, 1.0, %v3248_v31  ;;  %v2602_v17 = vsel %vm1693_vm8, 1.0, %v3248_v31  ;;  %v1713_v54 = vrot.slane %v4407_v20, %v4288_v44 }
 0x31b   : >> { %v1901_v13 = vrot.slane %v4376_v33, %v4280_v55  ;;  %v2958_v60 = vpack.i.bf16 %v2602_v17, %v2601_v58  ;;  %v1733_v42 = vrot.slane %v4376_v33, %v4288_v44  ;;  %v1923_v53 = vrot.slane %v4407_v20, %v4277_v52 }
 0x31c   : >> { %v1755_v57 = vrot.slane %v4407_v20, %v4296_v51  ;;  %2944 = vrot.lane.b32.xlu0 %v2943_v41, %s3255_s21  ;;  %vm1882_vm9 = vcmp.eq.s32.totalorder %v1881_v9, %v4240_v25  ;;  %vm1883_vm10 = vcmp.eq.s32.totalorder %v1881_v9, %v4243_v7  ;;  %vm1714_vm11 = vcmp.eq.s32.totalorder %v1713_v54, %v4240_v25 }
 0x31d   : >> { %2954 = vrot.lane.b32.xlu1 %v2953_v50, %s3255_s21  ;;  %v2637_v55 = vsel %vm1882_vm9, 1.0, %v3248_v31  ;;  %v2638_v44 = vsel %vm1883_vm10, 1.0, %v3248_v31  ;;  %vm1715_vm12 = vcmp.eq.s32.totalorder %v1713_v54, %v4243_v7  ;;  %v2605_v4 = vsel %vm1714_vm11, 1.0, %v3248_v31 }
 0x31e   : >> { %v2606_v16 = vsel %vm1715_vm12, 1.0, %v3248_v31  ;;  %vm1902_vm13 = vcmp.eq.s32.totalorder %v1901_v13, %v4240_v25  ;;  %vm1903_vm14 = vcmp.eq.s32.totalorder %v1901_v13, %v4243_v7  ;;  %v2963_v56 = vpack.i.bf16 %v2638_v44, %v2637_v55 }
 0x31f   : >> { %v2641_v3 = vsel %vm1902_vm13, 1.0, %v3248_v31  ;;  %v2642_v30 = vsel %vm1903_vm14, 1.0, %v3248_v31  ;;  %vm1734_vm15 = vcmp.eq.s32.totalorder %v1733_v42, %v4240_v25  ;;  %v2968_v36 = vpack.i.bf16 %v2606_v16, %v2605_v4 }
 0x320   : >> { %2949 = vrot.lane.b32.xlu0 %v2948_v2, %s3252_s10  ;;  %vm1735_vm1 = vcmp.eq.s32.totalorder %v1733_v42, %v4243_v7  ;;  %vm1924_vm2 = vcmp.eq.s32.totalorder %v1923_v53, %v4240_v25  ;;  %v2609_v49 = vsel %vm1734_vm15, 1.0, %v3248_v31  ;;  %vm1925_vm3 = vcmp.eq.s32.totalorder %v1923_v53, %v4243_v7 }
 0x321   : >> { %2959 = vrot.lane.b32.xlu1 %v2958_v60, %s3252_s10  ;;  %v2610_v5 = vsel %vm1735_vm1, 1.0, %v3248_v31  ;;  %vm1756_vm4 = vcmp.eq.s32.totalorder %v1755_v57, %v4240_v25  ;;  %v2973_v14 = vpack.i.bf16 %v2642_v30, %v2641_v3  ;;  %v2645_v37 = vsel %vm1924_vm2, 1.0, %v3248_v31 }
 0x322   : >> { %v2646_v21 = vsel %vm1925_vm3, 1.0, %v3248_v31  ;;  %vm1757_vm5 = vcmp.eq.s32.totalorder %v1755_v57, %v4243_v7  ;;  %v2613_v12 = vsel %vm1756_vm4, 1.0, %v3248_v31  ;;  %v1943_v10 = vrot.slane %v4376_v33, %v4277_v52 }
 0x323   : >> { %v2614_v34 = vsel %vm1757_vm5, 1.0, %v3248_v31  ;;  %v1775_v24 = vrot.slane %v4376_v33, %v4296_v51  ;;  %v2978_v48 = vpack.i.bf16 %v2610_v5, %v2609_v49  ;;  %v1965_v43 = vrot.slane %v4407_v20, %v4285_v1 }
 0x324   : >> { %2964 = vrot.lane.b32.xlu0 %v2963_v56, %s3250_s20  ;;  %v1797_v8 = vrot.slane %v4407_v20, %v4302_v11  ;;  %vm1944_vm6 = vcmp.eq.s32.totalorder %v1943_v10, %v4240_v25  ;;  %vm1945_vm7 = vcmp.eq.s32.totalorder %v1943_v10, %v4243_v7  ;;  %v2983_v52 = vpack.i.bf16 %v2646_v21, %v2645_v37 }
 0x325   : >> { %2969 = vrot.lane.b32.xlu1 %v2968_v36, %s3250_s20  ;;  %vm1776_vm8 = vcmp.eq.s32.totalorder %v1775_v24, %v4240_v25  ;;  %vm1777_vm9 = vcmp.eq.s32.totalorder %v1775_v24, %v4243_v7  ;;  %v2988_v51 = vpack.i.bf16 %v2614_v34, %v2613_v12  ;;  %v2649_v23 = vsel %vm1944_vm6, 1.0, %v3248_v31 }
 0x326   : >> { %v2650_v35 = vsel %vm1945_vm7, 1.0, %v3248_v31  ;;  %v2617_v47 = vsel %vm1776_vm8, 1.0, %v3248_v31  ;;  %v2618_v61 = vsel %vm1777_vm9, 1.0, %v3248_v31  ;;  %vm1966_vm10 = vcmp.eq.s32.totalorder %v1965_v43, %v4240_v25 }
 0x327   : >> { %vm1967_vm11 = vcmp.eq.s32.totalorder %v1965_v43, %v4243_v7  ;;  %v2993_v28 = vpack.i.bf16 %v2650_v35, %v2649_v23  ;;  %v2653_v62 = vsel %vm1966_vm10, 1.0, %v3248_v31  ;;  %vm1798_vm12 = vcmp.eq.s32.totalorder %v1797_v8, %v4240_v25 }
 0x328   : >> { %2974 = vrot.lane.b32.xlu0 %v2973_v14, %s3253_s12  ;;  %vm1799_vm13 = vcmp.eq.s32.totalorder %v1797_v8, %v4243_v7  ;;  %v2654_v38 = vsel %vm1967_vm11, 1.0, %v3248_v31  ;;  %v2621_v26 = vsel %vm1798_vm12, 1.0, %v3248_v31  ;;  %v1985_v59 = vrot.slane %v4376_v33, %v4285_v1 }
 0x329   : >> { %2979 = vrot.lane.b32.xlu1 %v2978_v48, %s3253_s12  ;;  %v2622_v40 = vsel %vm1799_vm13, 1.0, %v3248_v31  ;;  %v2998_v45 = vpack.i.bf16 %v2618_v61, %v2617_v47  ;;  %v1817_v39 = vrot.slane %v4376_v33, %v4302_v11  ;;  %v1849_v29 = vrot.slane %v4305_v18, %v4291_v15 }
 0x32a   : >> { %v1681_v27 = vrot.slane %v4305_v18, %v4299_v22  ;;  %vm1986_vm14 = vcmp.eq.s32.totalorder %v1985_v59, %v4240_v25  ;;  %vm1987_vm15 = vcmp.eq.s32.totalorder %v1985_v59, %v4243_v7  ;;  %v1839_v46 = vrot.slane %v4407_v20, %v4291_v15 }
 0x32b   : >> { %v1671_v1 = vrot.slane %v4407_v20, %v4299_v22  ;;  %v3003_v11 = vpack.i.bf16 %v2654_v38, %v2653_v62  ;;  %v3008_v33 = vpack.i.bf16 %v2622_v40, %v2621_v26  ;;  %vm1818_vm1 = vcmp.eq.s32.totalorder %v1817_v39, %v4240_v25 }
 0x32c   : >> { %2984 = vrot.lane.b32.xlu0 %v2983_v52, %s3249_s26  ;;  %v2657_v18 = vsel %vm1986_vm14, 1.0, %v3248_v31  ;;  %v2658_v41 = vsel %vm1987_vm15, 1.0, %v3248_v31  ;;  %vm1819_vm2 = vcmp.eq.s32.totalorder %v1817_v39, %v4243_v7  ;;  %vm1850_vm3 = vcmp.eq.s32.totalorder %v1849_v29, %v4240_v25 }
 0x32d   : >> { %2989 = vrot.lane.b32.xlu1 %v2988_v51, %s3249_s26  ;;  %v2625_v15 = vsel %vm1818_vm1, 1.0, %v3248_v31  ;;  %vm1851_vm4 = vcmp.eq.s32.totalorder %v1849_v29, %v4243_v7  ;;  %v2631_v22 = vsel %vm1850_vm3, 1.0, %v3248_v31  ;;  %vm1682_vm5 = vcmp.eq.s32.totalorder %v1681_v27, %v4240_v25  ;;  %s3111_s26 = scalar_lea.vmem (%p1632_p3), %s4637_s13, 256 }
 0x32e   : >> { %v2632_v20 = vsel %vm1851_vm4, 1.0, %v3248_v31  ;;  %vm1683_vm6 = vcmp.eq.s32.totalorder %v1681_v27, %v4243_v7  ;;  %v2599_v63 = vsel %vm1682_vm5, 1.0, %v3248_v31  ;;  %vm1840_vm7 = vcmp.eq.s32.totalorder %v1839_v46, %v4240_v25  ;;  %p3112_p7 = scmp.ne.s32.totalorder (%p1632_p3), %s4637_s13, %s3111_s26 }
 0x32f   : >> { %v2600_v0 = vsel %vm1683_vm6, 1.0, %v3248_v31  ;;  %vm1841_vm8 = vcmp.eq.s32.totalorder %v1839_v46, %v4243_v7  ;;  %v4526_v50 = vsel %vm1840_vm7, 1.0, %v3248_v31  ;;  %vm1672_vm9 = vcmp.eq.s32.totalorder %v1671_v1, %v4240_v25 }
 0x330   : >> { %2994 = vrot.lane.b32.xlu0 %v2993_v28, %s3254_s23  ;;  %v2626_v2 = vsel %vm1819_vm2, 1.0, %v3248_v31  ;;  %v4533_v58 = vsel %vm1841_vm8, 1.0, %v3248_v31  ;;  %vm1673_vm10 = vcmp.eq.s32.totalorder %v1671_v1, %v4243_v7  ;;  %v4537_v17 = vsel %vm1672_vm9, 1.0, %v3248_v31  ;;  %p3113_p9 = pnand (%p1632_p3), %p3112_p7, %p3379_p12 }
 0x331   : >> { %2999 = vrot.lane.b32.xlu1 %v2998_v45, %s3254_s23  ;;  %v4540_v9 = vsel %vm1673_vm10, 1.0, %v3248_v31  ;;  %v3013_v54 = vpack.i.bf16 %v2658_v41, %v2657_v18  ;;  %v3018_v13 = vpack.i.bf16 %v2626_v2, %v2625_v15  ;;  %vm2118_vm11 = vcmask 261120  }
 0x332   : >> { %vm2121_vm12 = vcmask 392192   ;;  %vm2124_vm13 = vcmask 523264   ;;  %vm2127_vm14 = vcmask 654336   ;;  %vm2130_vm15 = vcmask 785408   ;;  %p3114_p1 = pneg (%p1632_p3), %p3113_p9 }
 0x333   : >> { %vm2133_vm1 = vcmask 916480  }
 0x334   : >> { %3004 = vrot.lane.b32.xlu0 %v3003_v11, %s3251_s25 }
 0x335   : >> { %3009 = vrot.lane.b32.xlu1 %v3008_v33, %s3251_s25 }
 0x338   : >> { %3014 = vrot.lane.b32.xlu0 %v3013_v54, %s3255_s21 }
 0x339   : >> { %3019 = vrot.lane.b32.xlu1 %v3018_v13, %s3255_s21 }
 0x376   : >> { %v2895_v60 = vpop.permute.xlu0 %2894 }
 0x377   : >> { %v2885_v42 = vpop.permute.xlu1 %2884  ;;  %v2897_v26 = vunpack.i.h.bf16 %v2895_v60  ;;  %v2896_v40 = vunpack.i.l.bf16 %v2895_v60 }
 0x378   : >> { %v2887_v37 = vunpack.i.h.bf16 %v2885_v42  ;;  %v2886_v21 = vunpack.i.l.bf16 %v2885_v42 }
 0x37a   : >> { %v4546_v53 = vpop.permute.xlu0 %2904 }
 0x37b   : >> { %v2890_v57 = vpop.permute.xlu1 %2889  ;;  %v2907_v2 = vunpack.i.h.bf16 %v4546_v53  ;;  %v2906_v54 = vunpack.i.l.bf16 %v4546_v53 }
 0x37c   : >> { %v2892_v12 = vunpack.i.h.bf16 %v2890_v57  ;;  %v2891_v34 = vunpack.i.l.bf16 %v2890_v57 }
 0x37e   : >> { %v2915_v55 = vpop.permute.xlu0 %2914 }
 0x37f   : >> { %v2900_v44 = vpop.permute.xlu1 %2899  ;;  %v2917_v4 = vunpack.i.h.bf16 %v2915_v55  ;;  %v2916_v31 = vunpack.i.l.bf16 %v2915_v55 }
 0x380   : >> { %v2902_v59 = vunpack.i.h.bf16 %v2900_v44  ;;  %v2901_v45 = vunpack.i.l.bf16 %v2900_v44 }
 0x381   : >> { %v2276_v36 = vsel %vm304_vm0, %v2631_v22, %v2916_v31  ;;  %v2277_v49 = vsel %vm304_vm0, %v2632_v20, %v2917_v4 }
 0x382   : >> { %v2920_v16 = vpop.permute.xlu0 %2919  ;;  %v2278_v51 = vsel %vm2118_vm11, %v2276_v36, %v2886_v21  ;;  %v2279_v23 = vsel %vm2118_vm11, %v2277_v49, %v2887_v37 }
 0x383   : >> { %v4548_v56 = vpop.permute.xlu1 %2909  ;;  %v2922_v3 = vunpack.i.h.bf16 %v2920_v16  ;;  %v2921_v30 = vunpack.i.l.bf16 %v2920_v16 }
 0x384   : >> { %v2912_v13 = vunpack.i.h.bf16 %v4548_v56  ;;  %v2911_v60 = vunpack.i.l.bf16 %v4548_v56 }
 0x385   : >> { %v2262_v5 = vsel %vm304_vm0, %v2599_v63, %v2921_v30  ;;  %v2263_v14 = vsel %vm304_vm0, %v2600_v0, %v2922_v3 }
 0x386   : >> { %v2925_v10 = vpop.permute.xlu0 %2924  ;;  %v2264_v35 = vsel %vm2118_vm11, %v2262_v5, %v2891_v34  ;;  %v2265_v47 = vsel %vm2118_vm11, %v2263_v14, %v2892_v12 }
 0x387   : >> { %v2930_v24 = vpop.permute.xlu1 %2929  ;;  %v2927_v48 = vunpack.i.h.bf16 %v2925_v10  ;;  %v2926_v43 = vunpack.i.l.bf16 %v2925_v10 }
 0x388   : >> { %v2932_v8 = vunpack.i.h.bf16 %v2930_v24  ;;  %v2931_v52 = vunpack.i.l.bf16 %v2930_v24 }
 0x389   : >> { %v2280_v61 = vsel %vm2121_vm12, %v2278_v51, %v2926_v43  ;;  %v2281_v28 = vsel %vm2121_vm12, %v2279_v23, %v2927_v48 }
 0x38a   : >> { %v2266_v62 = vsel %vm2121_vm12, %v2264_v35, %v2931_v52  ;;  %v2267_v38 = vsel %vm2121_vm12, %v2265_v47, %v2932_v8  ;;  %v2935_v39 = vpop.permute.xlu0 %2934  ;;  %v2282_v33 = vsel %vm2124_vm13, %v2280_v61, %v2896_v40  ;;  %v2283_v18 = vsel %vm2124_vm13, %v2281_v28, %v2897_v26 }
 0x38b   : >> { %v2940_v29 = vpop.permute.xlu1 %2939  ;;  %v2937_v27 = vunpack.i.h.bf16 %v2935_v39  ;;  %v2936_v46 = vunpack.i.l.bf16 %v2935_v39  ;;  %v2268_v41 = vsel %vm2124_vm13, %v2266_v62, %v2901_v45  ;;  %v2269_v15 = vsel %vm2124_vm13, %v2267_v38, %v2902_v59 }
 0x38c   : >> { %v2942_v1 = vunpack.i.h.bf16 %v2940_v29  ;;  %v2941_v11 = vunpack.i.l.bf16 %v2940_v29 }
 0x38d   : >> { %v2284_v22 = vsel %vm2127_vm14, %v2282_v33, %v2936_v46  ;;  %v2285_v20 = vsel %vm2127_vm14, %v2283_v18, %v2937_v27 }
 0x38e   : >> { %v2270_v63 = vsel %vm2127_vm14, %v2268_v41, %v2941_v11  ;;  %v2271_v0 = vsel %vm2127_vm14, %v2269_v15, %v2942_v1  ;;  %v2945_v42 = vpop.permute.xlu0 %2944  ;;  %v2286_v16 = vsel %vm2130_vm15, %v2284_v22, %v2906_v54  ;;  %v2287_v3 = vsel %vm2130_vm15, %v2285_v20, %v2907_v2 }
 0x38f   : >> { %v2955_v57 = vpop.permute.xlu1 %2954  ;;  %v2947_v55 = vunpack.i.h.bf16 %v2945_v42  ;;  %v2946_v44 = vunpack.i.l.bf16 %v2945_v42  ;;  %v2272_v30 = vsel %vm2130_vm15, %v2270_v63, %v2911_v60  ;;  %v2273_v36 = vsel %vm2130_vm15, %v2271_v0, %v2912_v13 }
 0x390   : >> { %v2957_v4 = vunpack.i.h.bf16 %v2955_v57  ;;  %v2956_v31 = vunpack.i.l.bf16 %v2955_v57 }
 0x391   : >> { %v2288_v53 = vsel %vm2133_vm1, %v2286_v16, %v2946_v44  ;;  %v2289_v49 = vsel %vm2133_vm1, %v2287_v3, %v2947_v55 }
 0x392   : >> { %v2274_v56 = vsel %vm2133_vm1, %v2272_v30, %v2956_v31  ;;  %v2275_v5 = vsel %vm2133_vm1, %v2273_v36, %v2957_v4  ;;  %v2950_v14 = vpop.permute.xlu0 %2949  ;;  %v2753_v21 = vpack.c.bf16 %v2289_v49, %v2288_v53 }
 0x393   : >> { %v2960_v37 = vpop.permute.xlu1 %2959  ;;  %v2755_v12 = vpack.c.bf16 %v2275_v5, %v2274_v56  ;;  %v2952_v43 = vunpack.i.h.bf16 %v2950_v14  ;;  %v2951_v8 = vunpack.i.l.bf16 %v2950_v14 }
 0x394   : >> { %2754 = vmatprep.subr.bf16.mxu0 %v2753_v21  ;;  %2759 = vmatprep.subr.bf16.mxu1 %v2753_v21  ;;  %v2962_v52 = vunpack.i.h.bf16 %v2960_v37  ;;  %v2961_v51 = vunpack.i.l.bf16 %v2960_v37 }
 0x395   : >> { %2756 = vmatpush1.bf16.xpose.msra.mxu0 %v2755_v12  ;;  %2760 = vmatpush1.bf16.xpose.msra.mxu1 %v2755_v12  ;;  %v2136_v38 = vsel %vm304_vm0, %v4526_v50, %v2951_v8  ;;  %v2137_v26 = vsel %vm304_vm0, %v4533_v58, %v2952_v43 }
 0x396   : >> { %v2965_v34 = vpop.permute.xlu0 %2964  ;;  %v2116_v40 = vsel %vm304_vm0, %v4537_v17, %v2961_v51  ;;  %v2117_v59 = vsel %vm304_vm0, %v4540_v9, %v2962_v52 }
 0x397   : >> { %v2970_v10 = vpop.permute.xlu1 %2969  ;;  %v2967_v47 = vunpack.i.h.bf16 %v2965_v34  ;;  %v2966_v61 = vunpack.i.l.bf16 %v2965_v34 }
 0x398   : >> { %v2972_v28 = vunpack.i.h.bf16 %v2970_v10  ;;  %v2971_v62 = vunpack.i.l.bf16 %v2970_v10 }
 0x399   : >> { %v2138_v11 = vsel %vm2118_vm11, %v2136_v38, %v2966_v61  ;;  %v2139_v33 = vsel %vm2118_vm11, %v2137_v26, %v2967_v47  ;;  %v2373_v26 = vstv (%p1632_p3), %s4247_s8 }
 0x39a   : >> { %v2975_v24 = vpop.permute.xlu0 %2974  ;;  %v2119_v50 = vsel %vm2118_vm11, %v2116_v40, %v2971_v62  ;;  %v2120_v58 = vsel %vm2118_vm11, %v2117_v59, %v2972_v28  ;;  %v2375_v40 = vstv (%p1632_p3), %s4245_s28  ;;  %s3256_s28 = smov (%p1632_p3), [#allocation8]  }
 0x39b   : >> { %v2980_v48 = vpop.permute.xlu1 %2979  ;;  %v2977_v29 = vunpack.i.h.bf16 %v2975_v24  ;;  %v2976_v27 = vunpack.i.l.bf16 %v2975_v24  ;;  %s3115_s8 = sshll.u32 (%p1632_p3), %s3256_s28, 4  ;;  %s3116_s8 = int_to_ptr.vmem [resolvable:$false] %s3115_s8 }
 0x39c   : >> { %v2982_v46 = vunpack.i.h.bf16 %v2980_v48  ;;  %v2981_v1 = vunpack.i.l.bf16 %v2980_v48  ;;  %s3117_s20 = scalar_lea.vmem (%p1632_p3), %s3116_s8, 512  ;;  %p3118_p5 = scmp.lt.s32.totalorder (%p1632_p3), %s4637_s13, %s3116_s8 }
 0x39d   : >> { %v2140_v54 = vsel %vm2121_vm12, %v2138_v11, %v2976_v27  ;;  %v2141_v13 = vsel %vm2121_vm12, %v2139_v33, %v2977_v29  ;;  %p3119_p2 = scmp.lt.s32.totalorder (%p1632_p3), %s3117_s20, %s3111_s26 }
 0x39e   : >> { %v2985_v23 = vpop.permute.xlu0 %2984  ;;  %v2122_v60 = vsel %vm2121_vm12, %v2119_v50, %v2981_v1  ;;  %v2123_v42 = vsel %vm2121_vm12, %v2120_v58, %v2982_v46 }
 0x39f   : >> { %v2990_v35 = vpop.permute.xlu1 %2989  ;;  %v2987_v18 = vunpack.i.h.bf16 %v2985_v23  ;;  %v2986_v41 = vunpack.i.l.bf16 %v2985_v23  ;;  %p3120_p6 = por (%p1632_p3), %p3119_p2, %p3118_p5 }
 0x3a0   : >> { %v2992_v17 = vunpack.i.h.bf16 %v2990_v35  ;;  %v2991_v15 = vunpack.i.l.bf16 %v2990_v35 }
 0x3a1   : >> { %v2142_v31 = vsel %vm2124_vm13, %v2140_v54, %v2986_v41  ;;  %v2143_v16 = vsel %vm2124_vm13, %v2141_v13, %v2987_v18  ;;  %p3121_p8 = pnand (%p1632_p3), %p3120_p6, %p3114_p1 }
 0x3a2   : >> { %v2995_v45 = vpop.permute.xlu0 %2994  ;;  %v2125_v3 = vsel %vm2124_vm13, %v2122_v60, %v2991_v15  ;;  %v2126_v30 = vsel %vm2124_vm13, %v2123_v42, %v2992_v17 }
 0x3a3   : >> { %v3000_v39 = vpop.permute.xlu1 %2999  ;;  %v2997_v22 = vunpack.i.h.bf16 %v2995_v45  ;;  %v2996_v9 = vunpack.i.l.bf16 %v2995_v45 }
 0x3a4   : >> { %v3002_v20 = vunpack.i.h.bf16 %v3000_v39  ;;  %v3001_v63 = vunpack.i.l.bf16 %v3000_v39 }
 0x3a5   : >> { %v2144_v49 = vsel %vm2127_vm14, %v2142_v31, %v2996_v9  ;;  %v2145_v56 = vsel %vm2127_vm14, %v2143_v16, %v2997_v22 }
 0x3a6   : >> { %v3005_v0 = vpop.permute.xlu0 %3004  ;;  %v2128_v5 = vsel %vm2127_vm14, %v2125_v3, %v3001_v63  ;;  %v2129_v14 = vsel %vm2127_vm14, %v2126_v30, %v3002_v20 }
 0x3a7   : >> { %v3010_v2 = vpop.permute.xlu1 %3009  ;;  %v3007_v57 = vunpack.i.h.bf16 %v3005_v0  ;;  %v3006_v55 = vunpack.i.l.bf16 %v3005_v0 }
 0x3a8   : >> { %v3012_v44 = vunpack.i.h.bf16 %v3010_v2  ;;  %v3011_v4 = vunpack.i.l.bf16 %v3010_v2 }
 0x3a9   : >> { %v2146_v10 = vsel %vm2130_vm15, %v2144_v49, %v3006_v55  ;;  %v2147_v24 = vsel %vm2130_vm15, %v2145_v56, %v3007_v57 }
 0x3aa   : >> { %v3015_v36 = vpop.permute.xlu0 %3014  ;;  %v2131_v48 = vsel %vm2130_vm15, %v2128_v5, %v3011_v4  ;;  %v2132_v43 = vsel %vm2130_vm15, %v2129_v14, %v3012_v44 }
 0x3ab   : >> { %v3020_v53 = vpop.permute.xlu1 %3019  ;;  %v3017_v37 = vunpack.i.h.bf16 %v3015_v36  ;;  %v3016_v21 = vunpack.i.l.bf16 %v3015_v36 }
 0x3ac   : >> { %v3022_v12 = vunpack.i.h.bf16 %v3020_v53  ;;  %v3021_v34 = vunpack.i.l.bf16 %v3020_v53 }
 0x3ad   : >> { %v2148_v8 = vsel %vm2133_vm1, %v2146_v10, %v3016_v21  ;;  %v2149_v52 = vsel %vm2133_vm1, %v2147_v24, %v3017_v37 }
 0x3ae   : >> { %v2134_v51 = vsel %vm2133_vm1, %v2131_v48, %v3021_v34  ;;  %v2135_v23 = vsel %vm2133_vm1, %v2132_v43, %v3022_v12  ;;  %2354 = vmatprep.mubr.f32.mxu0 %v2148_v8  ;;  %2359 = vmatprep.mubr.f32.mxu1 %v2149_v52 }
 0x3af   : >> { %2355 = vmatmul.mubr.f32.vlgmr.msra.gmra.mrb[0].mxu0 %v2134_v51  ;;  %2360 = vmatmul.mubr.f32.vlgmr.msra.gmra.mrb[0].mxu1 %v2135_v23 }
 0x47f   : > { %1634 = sbr.rel (!%p1632_p3) target bundleno = 748 (0x2ec), region = 120 }
 0x482   : >> { %v2356_v35 = vpop.f32.mrb[0].mxu0  ;;  %v2361_v47 = vpop.f32.mrb[0].mxu1 }
 0x483   : >> { %v2365_v61 = vadd.f32 %v3237_v19, %v2356_v35   ;;  %v2366_v28 = vadd.f32 %v3233_v6, %v2361_v47   ;;  %v2358_v62 = vpop.f32.mrb[1].mxu0  ;;  %v2363_v38 = vpop.f32.mrb[1].mxu1 }
 0x485   : >> { %v4827_v6 = vmov %v2366_v28  ;;  %v4828_v19 = vmov %v2365_v61  ;;  %2367 = vst.msk [vmem:[%s4249_s9] sm:$0xff] (%p1632_p3), %vm304_vm0, %v2365_v61  ;;  %2368 = vst.msk [vmem:[%s4249_s9 + $0x8] sm:$0xff] (%p1632_p3), %vm304_vm0, %v2366_v28 }
 0x486   : > { %v2370_v19 = vand.u32 127, %v1627_v32 }
 0x488   : > { %vm2371_vm2 = vcmp.eq.s32.totalorder %v2370_v19, 0  ;;  %vm2372_vm3 = vcmp.eq.s32.totalorder %v2370_v19, 1 }
 0x489   : > { %v2374_v25 = vsel %vm2372_vm3, %v2373_v26, 0.0 }
 0x48a   : > { %v2376_v7 = vsel %vm2371_vm2, %v2375_v40, %v2374_v25 }
 0x48b   : > { %3124 = shalt.err (!%p3121_p8)
}
 0x48c   : > { %s3125_s9 = scalar_lea.hbm %s4634_s11, 256  ;;  %s3129_s12 = scalar_lea.hbm %s4712_s3, 512 }
 0x48d   : > { %p3126_p10 = scmp.ne.s32.totalorder %s4634_s11, %s3125_s9  ;;  %p3130_p11 = scmp.lt.u32.totalorder %s4634_s11, %s4712_s3 }
 0x48e   : > { %p3131_p13 = scmp.lt.u32.totalorder %s3129_s12, %s3125_s9  ;;  %p3133_p7 = scmp.lt.u32.totalorder %s3125_s9, %s4634_s11 }
 0x48f   : > { %p3127_p0 = pnand %p3126_p10, %p3379_p12 }
 0x490   : > { %p3132_p3 = por %p3131_p13, %p3130_p11 }
 0x491   : > { %p3128_p4 = pneg %p3127_p0 }
 0x492   : > { %p3134_p9 = por %p3133_p7, %p3132_p3 }
 0x494   : > { %p3135_p1 = pnand %p3134_p9, %p3128_p4 }
 0x496   : > { %3138 = shalt.err (!%p3135_p1)
}
 0x497   : > { %s3257_s14 = smov 128   ;;  %s3258_s6 = smov 8   ;;  %2377 = vst [vmem:[%s279_s5] sm:$0x1] %v2376_v7 }
 0x498   : > { %2782 = dma.vmem_to_hbm [thread:$0]  (%p3379_p12), %s4637_s13, 256, %s4634_s11, %s2379_s7, %s3257_s14, %s3257_s14, %s3258_s6  }
 0x499   : > { %s2664_s29 = sshll.u32 %s3306_s19, 4  ;;  %s2412_s26 = sshll.u32 %s279_s5, 4  ;;  %s2413_s26 = int_to_ptr.vmem [resolvable:$true] %s2412_s26 }
 0x49a   : > { %s4671_s20 = scalar_lea.hbm %s4713_s4, %s2664_s29  ;;  %s2384_s9 = scalar_lea.sflag [#allocation10], %s3477_s0 }
 0x49b   : > { %s3139_s25 = scalar_lea.vmem %s2413_s26, 16  ;;  %s3259_s10 = smov [#allocation9]  }
 0x49c   : > { %p3140_p5 = scmp.ne.s32.totalorder %s2413_s26, %s3139_s25  ;;  %s3143_s12 = sshll.u32 %s3259_s10, 4  ;;  %s3144_s12 = int_to_ptr.vmem [resolvable:$false] %s3143_s12 }
 0x49d   : > { %s3145_s11 = scalar_lea.vmem %s3144_s12, 32  ;;  %p3146_p8 = scmp.lt.s32.totalorder %s2413_s26, %s3144_s12 }
 0x49e   : > { %p3141_p2 = pnand %p3140_p5, %p3379_p12  ;;  %p3147_p10 = scmp.lt.s32.totalorder %s3145_s11, %s3139_s25 }
 0x4a0   : > { %p3142_p6 = pneg %p3141_p2  ;;  %p3148_p0 = por %p3147_p10, %p3146_p8 }
 0x4a2   : > { %p3149_p4 = pnand %p3148_p0, %p3142_p6 }
 0x4a4   : > { %3152 = shalt.err (!%p3149_p4)
}
 0x4a5   : > { %s3153_s19 = scalar_lea.hbm %s4671_s20, 16  ;;  %s3157_s13 = scalar_lea.hbm %s4713_s4, 32 }
 0x4a6   : > { %p3154_p11 = scmp.ne.s32.totalorder %s4671_s20, %s3153_s19  ;;  %p3158_p7 = scmp.lt.u32.totalorder %s4671_s20, %s4713_s4 }
 0x4a7   : > { %p3159_p9 = scmp.lt.u32.totalorder %s3157_s13, %s3153_s19  ;;  %p3161_p5 = scmp.lt.u32.totalorder %s3153_s19, %s4671_s20 }
 0x4a8   : > { %p3155_p13 = pnand %p3154_p11, %p3379_p12 }
 0x4a9   : > { %p3160_p1 = por %p3159_p9, %p3158_p7 }
 0x4aa   : > { %p3156_p3 = pneg %p3155_p13 }
 0x4ab   : > { %p3162_p2 = por %p3161_p5, %p3160_p1 }
 0x4ad   : > { %p3163_p6 = pnand %p3162_p2, %p3156_p3 }
 0x4af   : > { %3166 = shalt.err (!%p3163_p6)
}
 0x4b0   : > { %2783 = dma.vmem_to_hbm [thread:$0]  (%p3379_p12), %s2413_s26, 16, %s4671_s20, %s2384_s9  }
 0x4b1 PF: > { %s2424_s21 = sand.u32 1, %s3217_s15   ;;  %p4829_p8 = scmp.ne.s32.totalorder %s4738_s22, 0 }
 0x4b2   : > { %p4830_p10 = scmp.ge.s32.totalorder %s3229_s18, 2  ;;  %s2425_s14 = scalar_lea.sflag [#allocation4], %s2424_s21 }
 0x4b4   : > { %p2798_p0 = pnand %p4830_p10, %p4829_p8 }
 0x4b6   : > { %3208 = dma.done.wait (!%p2798_p0), %s2425_s14, 256  }
 0x4b7   : > { %3210 = vsyncadd (!%p2798_p0), %s2425_s14, 4294967040  ;;  %s2434_s6 = scalar_lea.sflag [#allocation10], %s2424_s21 }
 0x4b8   : > { %3212 = dma.done.wait (!%p2798_p0), %s2434_s6, 16  }
 0x4b9   : > { %3214 = vsyncadd (!%p2798_p0), %s2434_s6, 4294967280  ;;  %p24_p12 = scmp.ge.s32.totalorder %s3341_s27, 4   ;;  %s4831_s15 = smov %s3221_s16 }
 0x4ba   : > { %s4832_s16 = smov %s3225_s17  ;;  %s4833_s17 = smov %s3375_s24 }
 0x4bb   : > { %s4834_s18 = smov %s3341_s27  ;;  %26 = sbr.rel (!%p24_p12) target bundleno = 11 (0xb), region = 131 }
 0x4c2   :  { %2438 = vsyncpa [#allocation3], 1 }
 0x4c3   :  { %2440 = vsyncpa [#allocation3 + $0x1], 1 }
 0x4c4   :  { %2441 = vsyncpa [#allocation6], 1 }
 0x4c5   :  { %2443 = vsyncpa [#allocation6 + $0x1], 1 }
 0x4c6   :  { %2444 = vsyncpa [#allocation4], 1 }
 0x4c7   :  { %2446 = vsyncpa [#allocation4 + $0x1], 1 }
 0x4c8   :  { %2447 = vsyncpa [#allocation10], 1 }
 0x4c9   :  { %2449 = vsyncpa [#allocation10 + $0x1], 1 }

</bundles_post_ra>
